<compile_context>
chip_gen: v5e
topology: v5e:2x2
jax: 0.10.0
libtpu: 0.0.40
codegen_flags: <defaults>
</compile_context>

<pallas_src>
import functools

import jax
import jax.numpy as jnp
from jax import lax
from jax.experimental import pallas as pl
from jax.experimental.pallas import tpu as pltpu


# ----------------------------------------------------------------------------
# Pallas kernel: one (batch element, time tile) window through all 5 layers.
# ----------------------------------------------------------------------------
def postnet_kernel(x_ref, w_ref, scale_ref, shift_ref, o_ref, buf_ref, *,
                   n_convs, ksize, tile_t, halo, guard, seq_len):
    pad = (ksize - 1) // 2
    wc = tile_t + 2 * halo                      # computed-window rows
    c = buf_ref.shape[-1]
    t_idx = pl.program_id(1)

    # Permanently-zero guard rows supply the conv taps of the window-edge rows
    # (their wrong-but-bounded influence propagates only L*pad <= halo rows
    # inward, never reaching the tile_t interior).
    buf_ref[:guard, :] = jnp.zeros((guard, c), jnp.bfloat16)
    buf_ref[guard + wc:guard + wc + guard, :] = jnp.zeros((guard, c),
                                                          jnp.bfloat16)
    # bf16 input window -> 16-row-aligned buffer interior.
    buf_ref[guard:guard + wc, :] = x_ref[...]

    # Window rows whose global time index falls outside [0, seq_len) must be
    # zero at EVERY layer's input (Conv1d re-applies zero padding per layer at
    # the sequence boundaries); the wrapper zero-pads layer 0, this mask
    # maintains it for the intermediate layers.
    row = lax.broadcasted_iota(jnp.int32, (wc, 1), 0)
    g_row = t_idx * tile_t - halo + row
    in_seq = jnp.logical_and(g_row >= 0, g_row < seq_len)        # (wc, 1)

    for l in range(n_convs):                    # static unroll: 5 layers
        # Per-tap MXU accumulation directly from ref slices.
        acc = None
        for k in range(ksize):                  # static unroll: 5 taps
            lo = guard - pad + k
            tap = buf_ref[lo:lo + wc, :]                          # (wc, C) bf16
            part = jnp.dot(tap, w_ref[l, k * c:(k + 1) * c, :],
                           preferred_element_type=jnp.float32)    # (wc, C) f32
            acc = part if acc is None else acc + part
        # Folded conv-bias + BatchNorm (eval): per-channel scale & shift (f32).
        y = acc * scale_ref[l:l + 1, :] + shift_ref[l:l + 1, :]
        if l < n_convs - 1:
            y = jnp.tanh(y)
            y = jnp.where(in_seq, y, 0.0)       # re-apply per-layer zero pad
            buf_ref[guard:guard + wc, :] = y.astype(jnp.bfloat16)
        else:
            # Final layer (no tanh): write only the interior rows, f32.
            o_ref[...] = y[halo:halo + tile_t, :].astype(o_ref.dtype)


def postnet_forward(x_btc, w_flat, scale, shift, *, tile_t=None,
                    halo=16, guard=16):
    """x_btc: (B, T, Cmax) channel-padded activations (Cmax multiple of 128)."""
    B, T, C = x_btc.shape
    L, KC, _ = w_flat.shape
    K = KC // C
    pad = (K - 1) // 2
    assert C % 128 == 0, "channel axis must be lane-dense (multiple of 128)"
    assert halo % 16 == 0 and guard % 16 == 0 and guard >= pad
    assert halo >= L * pad, "halo must absorb the L-layer receptive field"

    if tile_t is None:
        tile_t = min(256, max(16, -(-T // 16) * 16))
    assert tile_t % 16 == 0
    n_tiles = -(-T // tile_t)
    T_pad = n_tiles * tile_t
    wc = tile_t + 2 * halo

    # bf16 input (kernel computes in bf16 anyway) -> halves the HBM read.
    xb = x_btc.astype(jnp.bfloat16)
    xp = jnp.pad(xb, ((0, 0), (halo, T_pad - T + halo), (0, 0)))
    # Overlapped per-tile windows (duplicates only 2*halo rows per tile).
    x_win = jnp.stack(
        [xp[:, i * tile_t:i * tile_t + wc, :] for i in range(n_tiles)], axis=1)

    # Per-step VMEM footprint -> explicit limit (never below the 32 MiB default).
    vmem_bytes = (2 * wc * C * 2            # input window, double-buffered bf16
                  + L * KC * C * 2          # packed weights, single-buffered
                  + 2 * L * C * 4           # BN scale + shift, single-buffered
                  + 2 * tile_t * C * 4      # output block, double-buffered f32
                  + (wc + 2 * guard) * C * 2  # activation scratch bf16
                  + wc * C * 4)             # f32 accumulator working set
    vmem_limit = int(min(100 << 20, max(32 << 20, int(1.5 * vmem_bytes))))

    kernel = functools.partial(postnet_kernel, n_convs=L, ksize=K,
                               tile_t=tile_t, halo=halo, guard=guard,
                               seq_len=T)
    out = pl.pallas_call(
        kernel,
        out_shape=jax.ShapeDtypeStruct((B, T_pad, C), jnp.float32),
        grid=(B, n_tiles),
        in_specs=[
            # per-(batch, tile) input window
            pl.BlockSpec((None, None, wc, C), lambda b, t: (b, t, 0, 0)),
            # grid-invariant operands: single pipeline buffer
            pl.BlockSpec((L, KC, C), lambda b, t: (0, 0, 0),
                         pipeline_mode=pl.Buffered(1)),
            pl.BlockSpec((L, C), lambda b, t: (0, 0),
                         pipeline_mode=pl.Buffered(1)),
            pl.BlockSpec((L, C), lambda b, t: (0, 0),
                         pipeline_mode=pl.Buffered(1)),
        ],
        out_specs=pl.BlockSpec((None, tile_t, C), lambda b, t: (b, t, 0)),
        scratch_shapes=[pltpu.VMEM((wc + 2 * guard, C), jnp.bfloat16)],
        compiler_params=pltpu.CompilerParams(
            dimension_semantics=("parallel", "parallel"),
            vmem_limit_bytes=vmem_limit),
    )(x_win, w_flat, scale, shift)
    return out[:, :T, :]


# ----------------------------------------------------------------------------
# Deterministic parameter construction (synthetic, in-script).
# ----------------------------------------------------------------------------
def make_params(key, n_mel, embed, ksize, n_convs):
    dims = [n_mel] + [embed] * (n_convs - 1) + [n_mel]
    params = []
    for l in range(n_convs):
        cin, cout = dims[l], dims[l + 1]
        key, k1, k2, k3, k4, k5, k6 = jax.random.split(key, 7)
        params.append(dict(
            w=jax.random.normal(k1, (cout, cin, ksize), jnp.float32) * 0.1,
            b=jax.random.normal(k2, (cout,), jnp.float32) * 0.1,
            gamma=1.0 + 0.1 * jax.random.normal(k3, (cout,), jnp.float32),
            beta=0.1 * jax.random.normal(k4, (cout,), jnp.float32),
            mean=0.1 * jax.random.normal(k5, (cout,), jnp.float32),
            var=1.0 + 0.5 * jax.random.uniform(k6, (cout,), jnp.float32),
        ))
    return params


def pack_params(params, cmax, eps=1e-5):
    """Fold conv bias + BatchNorm (eval) into scale/shift; pad channels to cmax.

    Weight layout matches the kernel's per-tap slices: feature f = k*cmax + cin,
    i.e. w_flat[l, k*cmax + cin, cout] = w_l[cout, cin, k].
    """
    L = len(params)
    K = params[0]['w'].shape[-1]
    w_packed = jnp.zeros((L, K, cmax, cmax), jnp.float32)
    scale = jnp.zeros((L, cmax), jnp.float32)
    shift = jnp.zeros((L, cmax), jnp.float32)
    for l, p in enumerate(params):
        cout, cin, _ = p['w'].shape
        inv_std = 1.0 / jnp.sqrt(p['var'] + eps)
        s = p['gamma'] * inv_std
        t = p['beta'] + s * (p['b'] - p['mean'])
        wk = jnp.transpose(p['w'], (2, 1, 0))       # (K, cin, cout)
        w_packed = w_packed.at[l, :, :cin, :cout].set(wk)
        scale = scale.at[l, :cout].set(s)
        shift = shift.at[l, :cout].set(t)
    w_flat = w_packed.reshape(L, K * cmax, cmax).astype(jnp.bfloat16)
    return w_flat, scale, shift


# ----------------------------------------------------------------------------
# Pure-JAX reference (NCW layout, mirrors PyTorch eval-mode forward, f32).
# ----------------------------------------------------------------------------
def postnet_ref(x_bct, params, ksize, eps=1e-5):
    pad = (ksize - 1) // 2
    y = x_bct
    L = len(params)
    for l, p in enumerate(params):
        z = lax.conv_general_dilated(
            y, p['w'], window_strides=(1,), padding=[(pad, pad)],
            dimension_numbers=('NCH', 'OIH', 'NCH'))
        z = z + p['b'][None, :, None]
        z = (p['gamma'][None, :, None] * (z - p['mean'][None, :, None])
             / jnp.sqrt(p['var'][None, :, None] + eps) + p['beta'][None, :, None])
        if l < L - 1:
            z = jnp.tanh(z)
        y = z
    return y


if __name__ == "__main__":
    # Small shapes consistent with the module: (batch, n_mel_channels, time).
    B, n_mel, T = 4, 16, 24
    embed, ksize, n_convs = 5 * [32, 5, 5][0] // 5, 5, 5   # embed=32, k=5, L=5
    embed = 32

    key = jax.random.PRNGKey(0)
    kx, kp = jax.random.split(key)
    x_bct = jax.random.normal(kx, (B, n_mel, T), jnp.float32)  # PyTorch NCW input
    params = make_params(kp, n_mel, embed, ksize, n_convs)

    # Lane-dense channel padding; never pad beyond 128 just to "fill" the MXU.
    cmax = 128
    assert max(n_mel, embed) <= cmax
    w_flat, scale, shift = pack_params(params, cmax)

    # (B, C, T) -> (B, T, Cmax) kernel layout, zero-padded channels.
    x_btc = jnp.transpose(x_bct, (0, 2, 1))
    x_btc = jnp.pad(x_btc, ((0, 0), (0, 0), (0, cmax - n_mel)))

    # tile_t=16 exercises the multi-tile (halo-recompute) path at this tiny T;
    # realistic runs use the default tile_t=256.
    out_btc = postnet_forward(x_btc, w_flat, scale, shift, tile_t=16)
    out_bct = jnp.transpose(out_btc[:, :, :n_mel], (0, 2, 1))  # back to (B, C, T)
    jax.block_until_ready(out_bct)

    ref = postnet_ref(x_bct, params, ksize)
    # bf16 MXU + bf16 inter-layer activations vs. f32 reference: relaxed tol.
    err = float(jnp.max(jnp.abs(out_bct - ref)))
    assert jnp.allclose(out_bct, ref, atol=5e-2, rtol=5e-2), err
    print("KERNEL_OK")
</pallas_src>

<mosaic_0001>
module attributes {stable_mosaic.version = 11 : i64} {
  func.func @postnet_kernel(%arg0: i32, %arg1: i32, %arg2: memref<1x1x48x128xbf16, #tpu.memory_space<vmem>>, %arg3: memref<5x640x128xbf16, #tpu.memory_space<vmem>>, %arg4: memref<5x128xf32, #tpu.memory_space<vmem>>, %arg5: memref<5x128xf32, #tpu.memory_space<vmem>>, %arg6: memref<1x16x128xf32, #tpu.memory_space<vmem>>, %arg7: memref<80x128xbf16, #tpu.memory_space<vmem>>) attributes {dimension_semantics = [#tpu.dimension_semantics<parallel>, #tpu.dimension_semantics<parallel>], iteration_bounds = array<i64: 4, 2>, scalar_prefetch = 0 : i64, scratch_operands = 1 : i64, tpu.core_type = #tpu.core_type<tc>, window_params = [{transform_indices = @transform_0, window_bounds = array<i64: 1, 1, 48, 128>}, {pipeline_mode = #tpu.pipeline_mode<synchronous>, transform_indices = @transform_1, window_bounds = array<i64: 5, 640, 128>}, {pipeline_mode = #tpu.pipeline_mode<synchronous>, transform_indices = @transform_2, window_bounds = array<i64: 5, 128>}, {pipeline_mode = #tpu.pipeline_mode<synchronous>, transform_indices = @transform_3, window_bounds = array<i64: 5, 128>}, {transform_indices = @transform_4, window_bounds = array<i64: 1, 16, 128>}]} {
    %cst = arith.constant 0.000000e+00 : bf16
    %0 = vector.broadcast %cst : bf16 to vector<16x128xbf16>
    %c0 = arith.constant 0 : index
    %c0_0 = arith.constant 0 : index
    %1 = vector.load %arg7[%c0, %c0_0] : memref<80x128xbf16, #tpu.memory_space<vmem>>, vector<16x128xbf16>
    tpu.vector_store %arg7[%c0, %c0_0], %0 {strides = array<i32>} : memref<80x128xbf16, #tpu.memory_space<vmem>>, vector<16x128xbf16>,
    %cst_1 = arith.constant 0.000000e+00 : bf16
    %2 = vector.broadcast %cst_1 : bf16 to vector<16x128xbf16>
    %c64 = arith.constant 64 : index
    %c0_2 = arith.constant 0 : index
    %3 = vector.load %arg7[%c64, %c0_2] : memref<80x128xbf16, #tpu.memory_space<vmem>>, vector<16x128xbf16>
    tpu.vector_store %arg7[%c64, %c0_2], %2 {strides = array<i32>} : memref<80x128xbf16, #tpu.memory_space<vmem>>, vector<16x128xbf16>,
    %c0_3 = arith.constant 0 : index
    %c0_4 = arith.constant 0 : index
    %c0_5 = arith.constant 0 : index
    %c0_6 = arith.constant 0 : index
    %4 = vector.load %arg2[%c0_3, %c0_4, %c0_5, %c0_6] : memref<1x1x48x128xbf16, #tpu.memory_space<vmem>>, vector<1x1x48x128xbf16>
    %5 = vector.shape_cast %4 : vector<1x1x48x128xbf16> to vector<48x128xbf16>
    %c16 = arith.constant 16 : index
    %c0_7 = arith.constant 0 : index
    %6 = vector.load %arg7[%c16, %c0_7] : memref<80x128xbf16, #tpu.memory_space<vmem>>, vector<48x128xbf16>
    tpu.vector_store %arg7[%c16, %c0_7], %5 {strides = array<i32>} : memref<80x128xbf16, #tpu.memory_space<vmem>>, vector<48x128xbf16>,
    %7 = tpu.iota {dimensions = array<i32: 0>} : vector<48x1xi32>
    %c16_i32 = arith.constant 16 : i32
    %8 = arith.muli %arg1, %c16_i32 : i32
    %c16_i32_8 = arith.constant 16 : i32
    %9 = arith.subi %8, %c16_i32_8 : i32
    %10 = vector.broadcast %9 : i32 to vector<48x1xi32>
    %11 = arith.addi %10, %7 : vector<48x1xi32>
    %c0_i32 = arith.constant 0 : i32
    %12 = vector.broadcast %c0_i32 : i32 to vector<48x1xi32>
    %13 = arith.cmpi sge, %11, %12 : vector<48x1xi32>
    %c24_i32 = arith.constant 24 : i32
    %14 = vector.broadcast %c24_i32 : i32 to vector<48x1xi32>
    %15 = arith.cmpi slt, %11, %14 : vector<48x1xi32>
    %16 = arith.andi %13, %15 : vector<48x1xi1>
    %c14 = arith.constant 14 : index
    %c0_9 = arith.constant 0 : index
    %17 = vector.load %arg7[%c14, %c0_9] : memref<80x128xbf16, #tpu.memory_space<vmem>>, vector<48x128xbf16>
    %c0_10 = arith.constant 0 : index
    %c0_11 = arith.constant 0 : index
    %c0_12 = arith.constant 0 : index
    %18 = vector.load %arg3[%c0_10, %c0_11, %c0_12] : memref<5x640x128xbf16, #tpu.memory_space<vmem>>, vector<1x128x128xbf16>
    %19 = vector.shape_cast %18 : vector<1x128x128xbf16> to vector<128x128xbf16>
    %cst_13 = arith.constant dense<0.000000e+00> : vector<48x128xf32>
    %20 = tpu.matmul %17, %19, %cst_13 {dimension_numbers = #tpu.dot_dimension_numbers<[1], [0], [0], [1], [0, 0, 1, 1], [], []>} : vector<48x128xbf16>, vector<128x128xbf16>, vector<48x128xf32> -> vector<48x128xf32>
    %c15 = arith.constant 15 : index
    %c0_14 = arith.constant 0 : index
    %21 = vector.load %arg7[%c15, %c0_14] : memref<80x128xbf16, #tpu.memory_space<vmem>>, vector<48x128xbf16>
    %c0_15 = arith.constant 0 : index
    %c128 = arith.constant 128 : index
    %c0_16 = arith.constant 0 : index
    %22 = vector.load %arg3[%c0_15, %c128, %c0_16] : memref<5x640x128xbf16, #tpu.memory_space<vmem>>, vector<1x128x128xbf16>
    %23 = vector.shape_cast %22 : vector<1x128x128xbf16> to vector<128x128xbf16>
    %cst_17 = arith.constant dense<0.000000e+00> : vector<48x128xf32>
    %24 = tpu.matmul %21, %23, %cst_17 {dimension_numbers = #tpu.dot_dimension_numbers<[1], [0], [0], [1], [0, 0, 1, 1], [], []>} : vector<48x128xbf16>, vector<128x128xbf16>, vector<48x128xf32> -> vector<48x128xf32>
    %25 = arith.addf %20, %24 : vector<48x128xf32>
    %c16_18 = arith.constant 16 : index
    %c0_19 = arith.constant 0 : index
    %26 = vector.load %arg7[%c16_18, %c0_19] : memref<80x128xbf16, #tpu.memory_space<vmem>>, vector<48x128xbf16>
    %c0_20 = arith.constant 0 : index
    %c256 = arith.constant 256 : index
    %c0_21 = arith.constant 0 : index
    %27 = vector.load %arg3[%c0_20, %c256, %c0_21] : memref<5x640x128xbf16, #tpu.memory_space<vmem>>, vector<1x128x128xbf16>
    %28 = vector.shape_cast %27 : vector<1x128x128xbf16> to vector<128x128xbf16>
    %cst_22 = arith.constant dense<0.000000e+00> : vector<48x128xf32>
    %29 = tpu.matmul %26, %28, %cst_22 {dimension_numbers = #tpu.dot_dimension_numbers<[1], [0], [0], [1], [0, 0, 1, 1], [], []>} : vector<48x128xbf16>, vector<128x128xbf16>, vector<48x128xf32> -> vector<48x128xf32>
    %30 = arith.addf %25, %29 : vector<48x128xf32>
    %c17 = arith.constant 17 : index
    %c0_23 = arith.constant 0 : index
    %31 = vector.load %arg7[%c17, %c0_23] : memref<80x128xbf16, #tpu.memory_space<vmem>>, vector<48x128xbf16>
    %c0_24 = arith.constant 0 : index
    %c384 = arith.constant 384 : index
    %c0_25 = arith.constant 0 : index
    %32 = vector.load %arg3[%c0_24, %c384, %c0_25] : memref<5x640x128xbf16, #tpu.memory_space<vmem>>, vector<1x128x128xbf16>
    %33 = vector.shape_cast %32 : vector<1x128x128xbf16> to vector<128x128xbf16>
    %cst_26 = arith.constant dense<0.000000e+00> : vector<48x128xf32>
    %34 = tpu.matmul %31, %33, %cst_26 {dimension_numbers = #tpu.dot_dimension_numbers<[1], [0], [0], [1], [0, 0, 1, 1], [], []>} : vector<48x128xbf16>, vector<128x128xbf16>, vector<48x128xf32> -> vector<48x128xf32>
    %35 = arith.addf %30, %34 : vector<48x128xf32>
    %c18 = arith.constant 18 : index
    %c0_27 = arith.constant 0 : index
    %36 = vector.load %arg7[%c18, %c0_27] : memref<80x128xbf16, #tpu.memory_space<vmem>>, vector<48x128xbf16>
    %c0_28 = arith.constant 0 : index
    %c512 = arith.constant 512 : index
    %c0_29 = arith.constant 0 : index
    %37 = vector.load %arg3[%c0_28, %c512, %c0_29] : memref<5x640x128xbf16, #tpu.memory_space<vmem>>, vector<1x128x128xbf16>
    %38 = vector.shape_cast %37 : vector<1x128x128xbf16> to vector<128x128xbf16>
    %cst_30 = arith.constant dense<0.000000e+00> : vector<48x128xf32>
    %39 = tpu.matmul %36, %38, %cst_30 {dimension_numbers = #tpu.dot_dimension_numbers<[1], [0], [0], [1], [0, 0, 1, 1], [], []>} : vector<48x128xbf16>, vector<128x128xbf16>, vector<48x128xf32> -> vector<48x128xf32>
    %40 = arith.addf %35, %39 : vector<48x128xf32>
    %c0_31 = arith.constant 0 : index
    %c0_32 = arith.constant 0 : index
    %41 = vector.load %arg4[%c0_31, %c0_32] : memref<5x128xf32, #tpu.memory_space<vmem>>, vector<1x128xf32>
    %42 = vector.broadcast %41 : vector<1x128xf32> to vector<48x128xf32>
    %43 = arith.mulf %40, %42 : vector<48x128xf32>
    %c0_33 = arith.constant 0 : index
    %c0_34 = arith.constant 0 : index
    %44 = vector.load %arg5[%c0_33, %c0_34] : memref<5x128xf32, #tpu.memory_space<vmem>>, vector<1x128xf32>
    %45 = vector.broadcast %44 : vector<1x128xf32> to vector<48x128xf32>
    %46 = arith.addf %43, %45 : vector<48x128xf32>
    %47 = math.tanh %46 : vector<48x128xf32>
    %cst_35 = arith.constant 0.000000e+00 : f32
    %48 = vector.shape_cast %16 : vector<48x1xi1> to vector<48x1xi1>
    %49 = vector.broadcast %48 : vector<48x1xi1> to vector<48x128xi1>
    %50 = vector.broadcast %cst_35 : f32 to vector<48x128xf32>
    %51 = arith.select %49, %47, %50 : vector<48x128xi1>, vector<48x128xf32>
    %52 = arith.truncf %51 : vector<48x128xf32> to vector<48x128xbf16>
    %c16_36 = arith.constant 16 : index
    %c0_37 = arith.constant 0 : index
    %53 = vector.load %arg7[%c16_36, %c0_37] : memref<80x128xbf16, #tpu.memory_space<vmem>>, vector<48x128xbf16>
    tpu.vector_store %arg7[%c16_36, %c0_37], %52 {strides = array<i32>} : memref<80x128xbf16, #tpu.memory_space<vmem>>, vector<48x128xbf16>,
    %c14_38 = arith.constant 14 : index
    %c0_39 = arith.constant 0 : index
    %54 = vector.load %arg7[%c14_38, %c0_39] : memref<80x128xbf16, #tpu.memory_space<vmem>>, vector<48x128xbf16>
    %c1 = arith.constant 1 : index
    %c0_40 = arith.constant 0 : index
    %c0_41 = arith.constant 0 : index
    %55 = vector.load %arg3[%c1, %c0_40, %c0_41] : memref<5x640x128xbf16, #tpu.memory_space<vmem>>, vector<1x128x128xbf16>
    %56 = vector.shape_cast %55 : vector<1x128x128xbf16> to vector<128x128xbf16>
    %cst_42 = arith.constant dense<0.000000e+00> : vector<48x128xf32>
    %57 = tpu.matmul %54, %56, %cst_42 {dimension_numbers = #tpu.dot_dimension_numbers<[1], [0], [0], [1], [0, 0, 1, 1], [], []>} : vector<48x128xbf16>, vector<128x128xbf16>, vector<48x128xf32> -> vector<48x128xf32>
    %c15_43 = arith.constant 15 : index
    %c0_44 = arith.constant 0 : index
    %58 = vector.load %arg7[%c15_43, %c0_44] : memref<80x128xbf16, #tpu.memory_space<vmem>>, vector<48x128xbf16>
    %c1_45 = arith.constant 1 : index
    %c128_46 = arith.constant 128 : index
    %c0_47 = arith.constant 0 : index
    %59 = vector.load %arg3[%c1_45, %c128_46, %c0_47] : memref<5x640x128xbf16, #tpu.memory_space<vmem>>, vector<1x128x128xbf16>
    %60 = vector.shape_cast %59 : vector<1x128x128xbf16> to vector<128x128xbf16>
    %cst_48 = arith.constant dense<0.000000e+00> : vector<48x128xf32>
    %61 = tpu.matmul %58, %60, %cst_48 {dimension_numbers = #tpu.dot_dimension_numbers<[1], [0], [0], [1], [0, 0, 1, 1], [], []>} : vector<48x128xbf16>, vector<128x128xbf16>, vector<48x128xf32> -> vector<48x128xf32>
    %62 = arith.addf %57, %61 : vector<48x128xf32>
    %c16_49 = arith.constant 16 : index
    %c0_50 = arith.constant 0 : index
    %63 = vector.load %arg7[%c16_49, %c0_50] : memref<80x128xbf16, #tpu.memory_space<vmem>>, vector<48x128xbf16>
    %c1_51 = arith.constant 1 : index
    %c256_52 = arith.constant 256 : index
    %c0_53 = arith.constant 0 : index
    %64 = vector.load %arg3[%c1_51, %c256_52, %c0_53] : memref<5x640x128xbf16, #tpu.memory_space<vmem>>, vector<1x128x128xbf16>
    %65 = vector.shape_cast %64 : vector<1x128x128xbf16> to vector<128x128xbf16>
    %cst_54 = arith.constant dense<0.000000e+00> : vector<48x128xf32>
    %66 = tpu.matmul %63, %65, %cst_54 {dimension_numbers = #tpu.dot_dimension_numbers<[1], [0], [0], [1], [0, 0, 1, 1], [], []>} : vector<48x128xbf16>, vector<128x128xbf16>, vector<48x128xf32> -> vector<48x128xf32>
    %67 = arith.addf %62, %66 : vector<48x128xf32>
    %c17_55 = arith.constant 17 : index
    %c0_56 = arith.constant 0 : index
    %68 = vector.load %arg7[%c17_55, %c0_56] : memref<80x128xbf16, #tpu.memory_space<vmem>>, vector<48x128xbf16>
    %c1_57 = arith.constant 1 : index
    %c384_58 = arith.constant 384 : index
    %c0_59 = arith.constant 0 : index
    %69 = vector.load %arg3[%c1_57, %c384_58, %c0_59] : memref<5x640x128xbf16, #tpu.memory_space<vmem>>, vector<1x128x128xbf16>
    %70 = vector.shape_cast %69 : vector<1x128x128xbf16> to vector<128x128xbf16>
    %cst_60 = arith.constant dense<0.000000e+00> : vector<48x128xf32>
    %71 = tpu.matmul %68, %70, %cst_60 {dimension_numbers = #tpu.dot_dimension_numbers<[1], [0], [0], [1], [0, 0, 1, 1], [], []>} : vector<48x128xbf16>, vector<128x128xbf16>, vector<48x128xf32> -> vector<48x128xf32>
    %72 = arith.addf %67, %71 : vector<48x128xf32>
    %c18_61 = arith.constant 18 : index
    %c0_62 = arith.constant 0 : index
    %73 = vector.load %arg7[%c18_61, %c0_62] : memref<80x128xbf16, #tpu.memory_space<vmem>>, vector<48x128xbf16>
    %c1_63 = arith.constant 1 : index
    %c512_64 = arith.constant 512 : index
    %c0_65 = arith.constant 0 : index
    %74 = vector.load %arg3[%c1_63, %c512_64, %c0_65] : memref<5x640x128xbf16, #tpu.memory_space<vmem>>, vector<1x128x128xbf16>
    %75 = vector.shape_cast %74 : vector<1x128x128xbf16> to vector<128x128xbf16>
    %cst_66 = arith.constant dense<0.000000e+00> : vector<48x128xf32>
    %76 = tpu.matmul %73, %75, %cst_66 {dimension_numbers = #tpu.dot_dimension_numbers<[1], [0], [0], [1], [0, 0, 1, 1], [], []>} : vector<48x128xbf16>, vector<128x128xbf16>, vector<48x128xf32> -> vector<48x128xf32>
    %77 = arith.addf %72, %76 : vector<48x128xf32>
    %c1_67 = arith.constant 1 : index
    %c0_68 = arith.constant 0 : index
    %78 = vector.load %arg4[%c1_67, %c0_68] : memref<5x128xf32, #tpu.memory_space<vmem>>, vector<1x128xf32>
    %79 = vector.broadcast %78 : vector<1x128xf32> to vector<48x128xf32>
    %80 = arith.mulf %77, %79 : vector<48x128xf32>
    %c1_69 = arith.constant 1 : index
    %c0_70 = arith.constant 0 : index
    %81 = vector.load %arg5[%c1_69, %c0_70] : memref<5x128xf32, #tpu.memory_space<vmem>>, vector<1x128xf32>
    %82 = vector.broadcast %81 : vector<1x128xf32> to vector<48x128xf32>
    %83 = arith.addf %80, %82 : vector<48x128xf32>
    %84 = math.tanh %83 : vector<48x128xf32>
    %cst_71 = arith.constant 0.000000e+00 : f32
    %85 = vector.shape_cast %16 : vector<48x1xi1> to vector<48x1xi1>
    %86 = vector.broadcast %85 : vector<48x1xi1> to vector<48x128xi1>
    %87 = vector.broadcast %cst_71 : f32 to vector<48x128xf32>
    %88 = arith.select %86, %84, %87 : vector<48x128xi1>, vector<48x128xf32>
    %89 = arith.truncf %88 : vector<48x128xf32> to vector<48x128xbf16>
    %c16_72 = arith.constant 16 : index
    %c0_73 = arith.constant 0 : index
    %90 = vector.load %arg7[%c16_72, %c0_73] : memref<80x128xbf16, #tpu.memory_space<vmem>>, vector<48x128xbf16>
    tpu.vector_store %arg7[%c16_72, %c0_73], %89 {strides = array<i32>} : memref<80x128xbf16, #tpu.memory_space<vmem>>, vector<48x128xbf16>,
    %c14_74 = arith.constant 14 : index
    %c0_75 = arith.constant 0 : index
    %91 = vector.load %arg7[%c14_74, %c0_75] : memref<80x128xbf16, #tpu.memory_space<vmem>>, vector<48x128xbf16>
    %c2 = arith.constant 2 : index
    %c0_76 = arith.constant 0 : index
    %c0_77 = arith.constant 0 : index
    %92 = vector.load %arg3[%c2, %c0_76, %c0_77] : memref<5x640x128xbf16, #tpu.memory_space<vmem>>, vector<1x128x128xbf16>
    %93 = vector.shape_cast %92 : vector<1x128x128xbf16> to vector<128x128xbf16>
    %cst_78 = arith.constant dense<0.000000e+00> : vector<48x128xf32>
    %94 = tpu.matmul %91, %93, %cst_78 {dimension_numbers = #tpu.dot_dimension_numbers<[1], [0], [0], [1], [0, 0, 1, 1], [], []>} : vector<48x128xbf16>, vector<128x128xbf16>, vector<48x128xf32> -> vector<48x128xf32>
    %c15_79 = arith.constant 15 : index
    %c0_80 = arith.constant 0 : index
    %95 = vector.load %arg7[%c15_79, %c0_80] : memref<80x128xbf16, #tpu.memory_space<vmem>>, vector<48x128xbf16>
    %c2_81 = arith.constant 2 : index
    %c128_82 = arith.constant 128 : index
    %c0_83 = arith.constant 0 : index
    %96 = vector.load %arg3[%c2_81, %c128_82, %c0_83] : memref<5x640x128xbf16, #tpu.memory_space<vmem>>, vector<1x128x128xbf16>
    %97 = vector.shape_cast %96 : vector<1x128x128xbf16> to vector<128x128xbf16>
    %cst_84 = arith.constant dense<0.000000e+00> : vector<48x128xf32>
    %98 = tpu.matmul %95, %97, %cst_84 {dimension_numbers = #tpu.dot_dimension_numbers<[1], [0], [0], [1], [0, 0, 1, 1], [], []>} : vector<48x128xbf16>, vector<128x128xbf16>, vector<48x128xf32> -> vector<48x128xf32>
    %99 = arith.addf %94, %98 : vector<48x128xf32>
    %c16_85 = arith.constant 16 : index
    %c0_86 = arith.constant 0 : index
    %100 = vector.load %arg7[%c16_85, %c0_86] : memref<80x128xbf16, #tpu.memory_space<vmem>>, vector<48x128xbf16>
    %c2_87 = arith.constant 2 : index
    %c256_88 = arith.constant 256 : index
    %c0_89 = arith.constant 0 : index
    %101 = vector.load %arg3[%c2_87, %c256_88, %c0_89] : memref<5x640x128xbf16, #tpu.memory_space<vmem>>, vector<1x128x128xbf16>
    %102 = vector.shape_cast %101 : vector<1x128x128xbf16> to vector<128x128xbf16>
    %cst_90 = arith.constant dense<0.000000e+00> : vector<48x128xf32>
    %103 = tpu.matmul %100, %102, %cst_90 {dimension_numbers = #tpu.dot_dimension_numbers<[1], [0], [0], [1], [0, 0, 1, 1], [], []>} : vector<48x128xbf16>, vector<128x128xbf16>, vector<48x128xf32> -> vector<48x128xf32>
    %104 = arith.addf %99, %103 : vector<48x128xf32>
    %c17_91 = arith.constant 17 : index
    %c0_92 = arith.constant 0 : index
    %105 = vector.load %arg7[%c17_91, %c0_92] : memref<80x128xbf16, #tpu.memory_space<vmem>>, vector<48x128xbf16>
    %c2_93 = arith.constant 2 : index
    %c384_94 = arith.constant 384 : index
    %c0_95 = arith.constant 0 : index
    %106 = vector.load %arg3[%c2_93, %c384_94, %c0_95] : memref<5x640x128xbf16, #tpu.memory_space<vmem>>, vector<1x128x128xbf16>
    %107 = vector.shape_cast %106 : vector<1x128x128xbf16> to vector<128x128xbf16>
    %cst_96 = arith.constant dense<0.000000e+00> : vector<48x128xf32>
    %108 = tpu.matmul %105, %107, %cst_96 {dimension_numbers = #tpu.dot_dimension_numbers<[1], [0], [0], [1], [0, 0, 1, 1], [], []>} : vector<48x128xbf16>, vector<128x128xbf16>, vector<48x128xf32> -> vector<48x128xf32>
    %109 = arith.addf %104, %108 : vector<48x128xf32>
    %c18_97 = arith.constant 18 : index
    %c0_98 = arith.constant 0 : index
    %110 = vector.load %arg7[%c18_97, %c0_98] : memref<80x128xbf16, #tpu.memory_space<vmem>>, vector<48x128xbf16>
    %c2_99 = arith.constant 2 : index
    %c512_100 = arith.constant 512 : index
    %c0_101 = arith.constant 0 : index
    %111 = vector.load %arg3[%c2_99, %c512_100, %c0_101] : memref<5x640x128xbf16, #tpu.memory_space<vmem>>, vector<1x128x128xbf16>
    %112 = vector.shape_cast %111 : vector<1x128x128xbf16> to vector<128x128xbf16>
    %cst_102 = arith.constant dense<0.000000e+00> : vector<48x128xf32>
    %113 = tpu.matmul %110, %112, %cst_102 {dimension_numbers = #tpu.dot_dimension_numbers<[1], [0], [0], [1], [0, 0, 1, 1], [], []>} : vector<48x128xbf16>, vector<128x128xbf16>, vector<48x128xf32> -> vector<48x128xf32>
    %114 = arith.addf %109, %113 : vector<48x128xf32>
    %c2_103 = arith.constant 2 : index
    %c0_104 = arith.constant 0 : index
    %115 = vector.load %arg4[%c2_103, %c0_104] : memref<5x128xf32, #tpu.memory_space<vmem>>, vector<1x128xf32>
    %116 = vector.broadcast %115 : vector<1x128xf32> to vector<48x128xf32>
    %117 = arith.mulf %114, %116 : vector<48x128xf32>
    %c2_105 = arith.constant 2 : index
    %c0_106 = arith.constant 0 : index
    %118 = vector.load %arg5[%c2_105, %c0_106] : memref<5x128xf32, #tpu.memory_space<vmem>>, vector<1x128xf32>
    %119 = vector.broadcast %118 : vector<1x128xf32> to vector<48x128xf32>
    %120 = arith.addf %117, %119 : vector<48x128xf32>
    %121 = math.tanh %120 : vector<48x128xf32>
    %cst_107 = arith.constant 0.000000e+00 : f32
    %122 = vector.shape_cast %16 : vector<48x1xi1> to vector<48x1xi1>
    %123 = vector.broadcast %122 : vector<48x1xi1> to vector<48x128xi1>
    %124 = vector.broadcast %cst_107 : f32 to vector<48x128xf32>
    %125 = arith.select %123, %121, %124 : vector<48x128xi1>, vector<48x128xf32>
    %126 = arith.truncf %125 : vector<48x128xf32> to vector<48x128xbf16>
    %c16_108 = arith.constant 16 : index
    %c0_109 = arith.constant 0 : index
    %127 = vector.load %arg7[%c16_108, %c0_109] : memref<80x128xbf16, #tpu.memory_space<vmem>>, vector<48x128xbf16>
    tpu.vector_store %arg7[%c16_108, %c0_109], %126 {strides = array<i32>} : memref<80x128xbf16, #tpu.memory_space<vmem>>, vector<48x128xbf16>,
    %c14_110 = arith.constant 14 : index
    %c0_111 = arith.constant 0 : index
    %128 = vector.load %arg7[%c14_110, %c0_111] : memref<80x128xbf16, #tpu.memory_space<vmem>>, vector<48x128xbf16>
    %c3 = arith.constant 3 : index
    %c0_112 = arith.constant 0 : index
    %c0_113 = arith.constant 0 : index
    %129 = vector.load %arg3[%c3, %c0_112, %c0_113] : memref<5x640x128xbf16, #tpu.memory_space<vmem>>, vector<1x128x128xbf16>
    %130 = vector.shape_cast %129 : vector<1x128x128xbf16> to vector<128x128xbf16>
    %cst_114 = arith.constant dense<0.000000e+00> : vector<48x128xf32>
    %131 = tpu.matmul %128, %130, %cst_114 {dimension_numbers = #tpu.dot_dimension_numbers<[1], [0], [0], [1], [0, 0, 1, 1], [], []>} : vector<48x128xbf16>, vector<128x128xbf16>, vector<48x128xf32> -> vector<48x128xf32>
    %c15_115 = arith.constant 15 : index
    %c0_116 = arith.constant 0 : index
    %132 = vector.load %arg7[%c15_115, %c0_116] : memref<80x128xbf16, #tpu.memory_space<vmem>>, vector<48x128xbf16>
    %c3_117 = arith.constant 3 : index
    %c128_118 = arith.constant 128 : index
    %c0_119 = arith.constant 0 : index
    %133 = vector.load %arg3[%c3_117, %c128_118, %c0_119] : memref<5x640x128xbf16, #tpu.memory_space<vmem>>, vector<1x128x128xbf16>
    %134 = vector.shape_cast %133 : vector<1x128x128xbf16> to vector<128x128xbf16>
    %cst_120 = arith.constant dense<0.000000e+00> : vector<48x128xf32>
    %135 = tpu.matmul %132, %134, %cst_120 {dimension_numbers = #tpu.dot_dimension_numbers<[1], [0], [0], [1], [0, 0, 1, 1], [], []>} : vector<48x128xbf16>, vector<128x128xbf16>, vector<48x128xf32> -> vector<48x128xf32>
    %136 = arith.addf %131, %135 : vector<48x128xf32>
    %c16_121 = arith.constant 16 : index
    %c0_122 = arith.constant 0 : index
    %137 = vector.load %arg7[%c16_121, %c0_122] : memref<80x128xbf16, #tpu.memory_space<vmem>>, vector<48x128xbf16>
    %c3_123 = arith.constant 3 : index
    %c256_124 = arith.constant 256 : index
    %c0_125 = arith.constant 0 : index
    %138 = vector.load %arg3[%c3_123, %c256_124, %c0_125] : memref<5x640x128xbf16, #tpu.memory_space<vmem>>, vector<1x128x128xbf16>
    %139 = vector.shape_cast %138 : vector<1x128x128xbf16> to vector<128x128xbf16>
    %cst_126 = arith.constant dense<0.000000e+00> : vector<48x128xf32>
    %140 = tpu.matmul %137, %139, %cst_126 {dimension_numbers = #tpu.dot_dimension_numbers<[1], [0], [0], [1], [0, 0, 1, 1], [], []>} : vector<48x128xbf16>, vector<128x128xbf16>, vector<48x128xf32> -> vector<48x128xf32>
    %141 = arith.addf %136, %140 : vector<48x128xf32>
    %c17_127 = arith.constant 17 : index
    %c0_128 = arith.constant 0 : index
    %142 = vector.load %arg7[%c17_127, %c0_128] : memref<80x128xbf16, #tpu.memory_space<vmem>>, vector<48x128xbf16>
    %c3_129 = arith.constant 3 : index
    %c384_130 = arith.constant 384 : index
    %c0_131 = arith.constant 0 : index
    %143 = vector.load %arg3[%c3_129, %c384_130, %c0_131] : memref<5x640x128xbf16, #tpu.memory_space<vmem>>, vector<1x128x128xbf16>
    %144 = vector.shape_cast %143 : vector<1x128x128xbf16> to vector<128x128xbf16>
    %cst_132 = arith.constant dense<0.000000e+00> : vector<48x128xf32>
    %145 = tpu.matmul %142, %144, %cst_132 {dimension_numbers = #tpu.dot_dimension_numbers<[1], [0], [0], [1], [0, 0, 1, 1], [], []>} : vector<48x128xbf16>, vector<128x128xbf16>, vector<48x128xf32> -> vector<48x128xf32>
    %146 = arith.addf %141, %145 : vector<48x128xf32>
    %c18_133 = arith.constant 18 : index
    %c0_134 = arith.constant 0 : index
    %147 = vector.load %arg7[%c18_133, %c0_134] : memref<80x128xbf16, #tpu.memory_space<vmem>>, vector<48x128xbf16>
    %c3_135 = arith.constant 3 : index
    %c512_136 = arith.constant 512 : index
    %c0_137 = arith.constant 0 : index
    %148 = vector.load %arg3[%c3_135, %c512_136, %c0_137] : memref<5x640x128xbf16, #tpu.memory_space<vmem>>, vector<1x128x128xbf16>
    %149 = vector.shape_cast %148 : vector<1x128x128xbf16> to vector<128x128xbf16>
    %cst_138 = arith.constant dense<0.000000e+00> : vector<48x128xf32>
    %150 = tpu.matmul %147, %149, %cst_138 {dimension_numbers = #tpu.dot_dimension_numbers<[1], [0], [0], [1], [0, 0, 1, 1], [], []>} : vector<48x128xbf16>, vector<128x128xbf16>, vector<48x128xf32> -> vector<48x128xf32>
    %151 = arith.addf %146, %150 : vector<48x128xf32>
    %c3_139 = arith.constant 3 : index
    %c0_140 = arith.constant 0 : index
    %152 = vector.load %arg4[%c3_139, %c0_140] : memref<5x128xf32, #tpu.memory_space<vmem>>, vector<1x128xf32>
    %153 = vector.broadcast %152 : vector<1x128xf32> to vector<48x128xf32>
    %154 = arith.mulf %151, %153 : vector<48x128xf32>
    %c3_141 = arith.constant 3 : index
    %c0_142 = arith.constant 0 : index
    %155 = vector.load %arg5[%c3_141, %c0_142] : memref<5x128xf32, #tpu.memory_space<vmem>>, vector<1x128xf32>
    %156 = vector.broadcast %155 : vector<1x128xf32> to vector<48x128xf32>
    %157 = arith.addf %154, %156 : vector<48x128xf32>
    %158 = math.tanh %157 : vector<48x128xf32>
    %cst_143 = arith.constant 0.000000e+00 : f32
    %159 = vector.shape_cast %16 : vector<48x1xi1> to vector<48x1xi1>
    %160 = vector.broadcast %159 : vector<48x1xi1> to vector<48x128xi1>
    %161 = vector.broadcast %cst_143 : f32 to vector<48x128xf32>
    %162 = arith.select %160, %158, %161 : vector<48x128xi1>, vector<48x128xf32>
    %163 = arith.truncf %162 : vector<48x128xf32> to vector<48x128xbf16>
    %c16_144 = arith.constant 16 : index
    %c0_145 = arith.constant 0 : index
    %164 = vector.load %arg7[%c16_144, %c0_145] : memref<80x128xbf16, #tpu.memory_space<vmem>>, vector<48x128xbf16>
    tpu.vector_store %arg7[%c16_144, %c0_145], %163 {strides = array<i32>} : memref<80x128xbf16, #tpu.memory_space<vmem>>, vector<48x128xbf16>,
    %c14_146 = arith.constant 14 : index
    %c0_147 = arith.constant 0 : index
    %165 = vector.load %arg7[%c14_146, %c0_147] : memref<80x128xbf16, #tpu.memory_space<vmem>>, vector<48x128xbf16>
    %c4 = arith.constant 4 : index
    %c0_148 = arith.constant 0 : index
    %c0_149 = arith.constant 0 : index
    %166 = vector.load %arg3[%c4, %c0_148, %c0_149] : memref<5x640x128xbf16, #tpu.memory_space<vmem>>, vector<1x128x128xbf16>
    %167 = vector.shape_cast %166 : vector<1x128x128xbf16> to vector<128x128xbf16>
    %cst_150 = arith.constant dense<0.000000e+00> : vector<48x128xf32>
    %168 = tpu.matmul %165, %167, %cst_150 {dimension_numbers = #tpu.dot_dimension_numbers<[1], [0], [0], [1], [0, 0, 1, 1], [], []>} : vector<48x128xbf16>, vector<128x128xbf16>, vector<48x128xf32> -> vector<48x128xf32>
    %c15_151 = arith.constant 15 : index
    %c0_152 = arith.constant 0 : index
    %169 = vector.load %arg7[%c15_151, %c0_152] : memref<80x128xbf16, #tpu.memory_space<vmem>>, vector<48x128xbf16>
    %c4_153 = arith.constant 4 : index
    %c128_154 = arith.constant 128 : index
    %c0_155 = arith.constant 0 : index
    %170 = vector.load %arg3[%c4_153, %c128_154, %c0_155] : memref<5x640x128xbf16, #tpu.memory_space<vmem>>, vector<1x128x128xbf16>
    %171 = vector.shape_cast %170 : vector<1x128x128xbf16> to vector<128x128xbf16>
    %cst_156 = arith.constant dense<0.000000e+00> : vector<48x128xf32>
    %172 = tpu.matmul %169, %171, %cst_156 {dimension_numbers = #tpu.dot_dimension_numbers<[1], [0], [0], [1], [0, 0, 1, 1], [], []>} : vector<48x128xbf16>, vector<128x128xbf16>, vector<48x128xf32> -> vector<48x128xf32>
    %173 = arith.addf %168, %172 : vector<48x128xf32>
    %c16_157 = arith.constant 16 : index
    %c0_158 = arith.constant 0 : index
    %174 = vector.load %arg7[%c16_157, %c0_158] : memref<80x128xbf16, #tpu.memory_space<vmem>>, vector<48x128xbf16>
    %c4_159 = arith.constant 4 : index
    %c256_160 = arith.constant 256 : index
    %c0_161 = arith.constant 0 : index
    %175 = vector.load %arg3[%c4_159, %c256_160, %c0_161] : memref<5x640x128xbf16, #tpu.memory_space<vmem>>, vector<1x128x128xbf16>
    %176 = vector.shape_cast %175 : vector<1x128x128xbf16> to vector<128x128xbf16>
    %cst_162 = arith.constant dense<0.000000e+00> : vector<48x128xf32>
    %177 = tpu.matmul %174, %176, %cst_162 {dimension_numbers = #tpu.dot_dimension_numbers<[1], [0], [0], [1], [0, 0, 1, 1], [], []>} : vector<48x128xbf16>, vector<128x128xbf16>, vector<48x128xf32> -> vector<48x128xf32>
    %178 = arith.addf %173, %177 : vector<48x128xf32>
    %c17_163 = arith.constant 17 : index
    %c0_164 = arith.constant 0 : index
    %179 = vector.load %arg7[%c17_163, %c0_164] : memref<80x128xbf16, #tpu.memory_space<vmem>>, vector<48x128xbf16>
    %c4_165 = arith.constant 4 : index
    %c384_166 = arith.constant 384 : index
    %c0_167 = arith.constant 0 : index
    %180 = vector.load %arg3[%c4_165, %c384_166, %c0_167] : memref<5x640x128xbf16, #tpu.memory_space<vmem>>, vector<1x128x128xbf16>
    %181 = vector.shape_cast %180 : vector<1x128x128xbf16> to vector<128x128xbf16>
    %cst_168 = arith.constant dense<0.000000e+00> : vector<48x128xf32>
    %182 = tpu.matmul %179, %181, %cst_168 {dimension_numbers = #tpu.dot_dimension_numbers<[1], [0], [0], [1], [0, 0, 1, 1], [], []>} : vector<48x128xbf16>, vector<128x128xbf16>, vector<48x128xf32> -> vector<48x128xf32>
    %183 = arith.addf %178, %182 : vector<48x128xf32>
    %c18_169 = arith.constant 18 : index
    %c0_170 = arith.constant 0 : index
    %184 = vector.load %arg7[%c18_169, %c0_170] : memref<80x128xbf16, #tpu.memory_space<vmem>>, vector<48x128xbf16>
    %c4_171 = arith.constant 4 : index
    %c512_172 = arith.constant 512 : index
    %c0_173 = arith.constant 0 : index
    %185 = vector.load %arg3[%c4_171, %c512_172, %c0_173] : memref<5x640x128xbf16, #tpu.memory_space<vmem>>, vector<1x128x128xbf16>
    %186 = vector.shape_cast %185 : vector<1x128x128xbf16> to vector<128x128xbf16>
    %cst_174 = arith.constant dense<0.000000e+00> : vector<48x128xf32>
    %187 = tpu.matmul %184, %186, %cst_174 {dimension_numbers = #tpu.dot_dimension_numbers<[1], [0], [0], [1], [0, 0, 1, 1], [], []>} : vector<48x128xbf16>, vector<128x128xbf16>, vector<48x128xf32> -> vector<48x128xf32>
    %188 = arith.addf %183, %187 : vector<48x128xf32>
    %c4_175 = arith.constant 4 : index
    %c0_176 = arith.constant 0 : index
    %189 = vector.load %arg4[%c4_175, %c0_176] : memref<5x128xf32, #tpu.memory_space<vmem>>, vector<1x128xf32>
    %190 = vector.broadcast %189 : vector<1x128xf32> to vector<48x128xf32>
    %191 = arith.mulf %188, %190 : vector<48x128xf32>
    %c4_177 = arith.constant 4 : index
    %c0_178 = arith.constant 0 : index
    %192 = vector.load %arg5[%c4_177, %c0_178] : memref<5x128xf32, #tpu.memory_space<vmem>>, vector<1x128xf32>
    %193 = vector.broadcast %192 : vector<1x128xf32> to vector<48x128xf32>
    %194 = arith.addf %191, %193 : vector<48x128xf32>
    %195 = vector.extract_strided_slice %194 {offsets = [16, 0], sizes = [16, 128], strides = [1, 1]} : vector<48x128xf32> to vector<16x128xf32>
    %c0_179 = arith.constant 0 : index
    %c0_180 = arith.constant 0 : index
    %c0_181 = arith.constant 0 : index
    %196 = vector.load %arg6[%c0_179, %c0_180, %c0_181] : memref<1x16x128xf32, #tpu.memory_space<vmem>>, vector<1x16x128xf32>
    %197 = vector.shape_cast %196 : vector<1x16x128xf32> to vector<16x128xf32>
    %198 = vector.shape_cast %195 : vector<16x128xf32> to vector<1x16x128xf32>
    tpu.vector_store %arg6[%c0_179, %c0_180, %c0_181], %198 {strides = array<i32>} : memref<1x16x128xf32, #tpu.memory_space<vmem>>, vector<1x16x128xf32>,
    return
  }
  func.func @transform_0(%arg0: i32, %arg1: i32) -> (i32, i32, i32, i32) {
    %c0_i32 = arith.constant 0 : i32
    %c0_i32_0 = arith.constant 0 : i32
    %c0_i32_1 = arith.constant 0 : i32
    return %arg0, %arg1, %c0_i32, %c0_i32_0 : i32, i32, i32, i32
  }
  func.func @transform_1(%arg0: i32, %arg1: i32) -> (i32, i32, i32) {
    %c0_i32 = arith.constant 0 : i32
    %c0_i32_0 = arith.constant 0 : i32
    %c0_i32_1 = arith.constant 0 : i32
    %c0_i32_2 = arith.constant 0 : i32
    return %c0_i32, %c0_i32_0, %c0_i32_1 : i32, i32, i32
  }
  func.func @transform_2(%arg0: i32, %arg1: i32) -> (i32, i32) {
    %c0_i32 = arith.constant 0 : i32
    %c0_i32_0 = arith.constant 0 : i32
    %c0_i32_1 = arith.constant 0 : i32
    return %c0_i32, %c0_i32_0 : i32, i32
  }
  func.func @transform_3(%arg0: i32, %arg1: i32) -> (i32, i32) {
    %c0_i32 = arith.constant 0 : i32
    %c0_i32_0 = arith.constant 0 : i32
    %c0_i32_1 = arith.constant 0 : i32
    return %c0_i32, %c0_i32_0 : i32, i32
  }
  func.func @transform_4(%arg0: i32, %arg1: i32) -> (i32, i32, i32) {
    %c0_i32 = arith.constant 0 : i32
    %c0_i32_0 = arith.constant 0 : i32
    return %arg0, %arg1, %c0_i32 : i32, i32, i32
  }
}

</mosaic_0001>

<bundles_post_ra>
// kernel: tpu_custom_call.1
= control target key start
LH: loop header
LB: loop body
LE: loop exit
PB: predicated region body
PF: predicated region fallthrough
CT: control target
= control target key end

     0   :  { %s6036_s0 = inlined_call_operand.hbm [shape: bf16[4,2,48,128], index: 0, kind: input, shape index: {}]   ;;  %s6037_s1 = inlined_call_operand.hbm [shape: bf16[5,640,128], index: 1, kind: input, shape index: {}]   ;;  %s6038_s2 = inlined_call_operand.hbm [shape: f32[5,128], index: 2, kind: input, shape index: {}]   ;;  %s6039_s3 = inlined_call_operand.hbm [shape: f32[5,128], index: 3, kind: input, shape index: {}]   ;;  %s6040_s4 = inlined_call_operand.hbm [shape: f32[4,32,128], index: 4, kind: output, shape index: {}]  }
   0x1   :  { %6048 = sst [smem:[#allocation21_spill]] %s6037_s1 }
   0x2   :  { %6049 = sst [smem:[#allocation22_spill]] %s6038_s2 }
   0x3   :  { %6050 = sst [smem:[#allocation23_spill]] %s6039_s3 }
   0x4   :  { %9 = vsyncpa [#allocation4], 0 }
   0x5   :  { %11 = vsyncpa [#allocation4 + $0x1], 0 }
   0x6   :  { %12 = vsyncpa [#allocation7], 0 }
   0x7   :  { %13 = vsyncpa [#allocation10], 0 }
   0x8   :  { %14 = vsyncpa [#allocation5], 0 }
   0x9   :  { %16 = vsyncpa [#allocation5 + $0x1], 0  ;;  %s5461_s15 = smov 0   ;;  %s5463_s16 = smov 0  }
   0xa   :  { %s5465_s17 = smov 0   ;;  %s5467_s18 = smov 0  }
   0xb   :  { %s5469_s19 = smov 0   ;;  %s5471_s20 = smov 0  }
   0xc   :  { %s5473_s21 = smov 0   ;;  %s5475_s22 = smov 0  }
   0xd LB: > { %6051 = sst [smem:[#allocation16_spill]] %s5398_s15  ;;  %s3684_s23 = sadd.s32 4294967295, %s5426_s22   ;;  %s5426_s22 = sphi %s5475_s22, %s22_s22   ;;  %s5422_s21 = sphi %s5473_s21, %s6093_s21   ;;  %s5418_s20 = sphi %s5471_s20, %s6087_s20   ;;  %s5414_s19 = sphi %s5469_s19, %s6092_s19   ;;  %s5410_s18 = sphi %s5467_s18, %s6086_s18   ;;  %s5406_s17 = sphi %s5465_s17, %s6091_s17   ;;  %s5402_s16 = sphi %s5463_s16, %s6090_s16   ;;  %s5398_s15 = sphi %s5461_s15, %s6089_s15  }
   0xe   : > { %6052 = sst [smem:[#allocation17_spill]] %s5418_s20  ;;  %s3685_s24 = sadd.s32 4294967294, %s5426_s22  }
   0xf   : > { %p56_p0 = scmp.ne.s32.totalorder %s5402_s16, %s5398_s15  ;;  %p5505_p1 = scmp.eq.s32.totalorder %s3684_s23, 0 }
  0x10   : > { %p5509_p2 = scmp.eq.s32.totalorder %s3684_s23, 7  ;;  %p151_p3 = scmp.eq.s32.totalorder %s3685_s24, 7 }
  0x11   : > { %p5515_p4 = por %p5505_p1, %p56_p0  ;;  %p3686_p5 = scmp.ge.s32.totalorder %s5426_s22, 1 }
  0x12   : > { %p5520_p6 = por %p151_p3, %p56_p0  ;;  %p158_p7 = scmp.lt.s32.totalorder %s5426_s22, 9 }
  0x13   : > { %s6058_s1 = sld [smem:[#allocation21_spill]]  ;;  %s5428_s7 = smov [#allocation6]  }
  0x14   : > { %s6056_s28 = scalar_select %p5520_p6, 1, 0 }
  0x15   : > { %p5528_p8 = pnand %p3686_p5, %p158_p7  ;;  %s171_s8 = sshll.u32 %s5428_s7, 4  ;;  %s172_s8 = int_to_ptr.vmem [resolvable:$true] %s171_s8 }
  0x16   : > { %6057 = sst [smem:[#allocation18_spill]] %s6056_s28  ;;  %s6041_s13 = smov 64  }
  0x17   : > { %p5013_p9 = pneg %p5528_p8  ;;  %s6061_s2 = sld [smem:[#allocation22_spill]] }
  0x18   : > { %s6042_s14 = smov 4   ;;  %s5431_s23 = smov [#allocation8]  }
  0x19   : > { %s169_s5 = sshll.u32 %s6058_s1, 4  ;;  %p5536_p10 = pnand %p5013_p9, %p5505_p1  ;;  %s170_s5 = int_to_ptr.hbm [resolvable:$true] %s169_s5 }
  0x1a   : > { %s186_s24 = sshll.u32 %s5431_s23, 4  ;;  %s6062_s3 = sld [smem:[#allocation23_spill]]  ;;  %s187_s24 = int_to_ptr.vmem [resolvable:$true] %s186_s24 }
  0x1b   : > { %5016 = dma.hbm_to_vmem [thread:$0]  (!%p5536_p10), %s170_s5, 25600, %s172_s8, [#allocation7], %s6041_s13, %s6041_s13, %s6042_s14  }
  0x1c   : > { %s5432_s10 = smov [#allocation9]   ;;  %s31_s5 = sadd.s32 1, %s5418_s20 }
  0x1d   : > { %s184_s12 = sshll.u32 %s6061_s2, 4  ;;  %s198_s11 = sshll.u32 %s5432_s10, 4  ;;  %s185_s12 = int_to_ptr.hbm [resolvable:$true] %s184_s12  ;;  %s199_s11 = int_to_ptr.vmem [resolvable:$true] %s198_s11 }
  0x1e   : > { %5019 = dma.hbm_to_vmem [thread:$0]  (!%p5536_p10), %s185_s12, 128, %s187_s24, [#allocation7]  }
  0x1f   : > { %p32_p11 = scmp.ge.s32.totalorder %s31_s5, 2  ;;  %s34_s8 = sadd.s32 1, %s5422_s21 }
  0x20   : > { %s196_s7 = sshll.u32 %s6062_s3, 4  ;;  %s43_s23 = sadd.s32 1, %s5406_s17  ;;  %s197_s7 = int_to_ptr.hbm [resolvable:$true] %s196_s7 }
  0x21   : > { %5022 = dma.hbm_to_vmem [thread:$0]  (!%p5536_p10), %s197_s7, 128, %s199_s11, [#allocation10]  }
  0x22   : > { %p50_p12 = scmp.ne.s32.totalorder %s5406_s17, %s5402_s16  ;;  %s6095_s5 = smov (%p32_p11, %s31_s5), 0 }
  0x23   : > { %6063 = sst [smem:[#allocation19_spill]] %s6095_s5  ;;  %s6097_s8 = smov (!%p32_p11, %s34_s8), %s5422_s21 }
  0x24   : > { %s39_s12 = ssub.s32 %s5418_s20, %s6095_s5  ;;  %p51_p13 = scmp.eq.s32.totalorder %s5426_s22, 0 }
  0x25   : > { %p36_p0 = scmp.ge.s32.totalorder %s6097_s8, 4  ;;  %p5568_p3 = por %p5509_p2, %p50_p12 }
  0x26   : > { %p52_p5 = por %p51_p13, %p50_p12  ;;  %p5034_p7 = scmp.lt.s32.totalorder %s5426_s22, 8 }
  0x27   : > { %s6099_s8 = smov (%p36_p0, %s6097_s8), 0  ;;  %s209_s24 = sand.u32 1, %s5406_s17  }
  0x28   : > { %6065 = sst [smem:[#allocation20_spill]] %s6099_s8  ;;  %s4994_s29 = smul.u32 6, %s5418_s20 }
  0x29   : > { %s38_s30 = ssub.s32 %s5422_s21, %s6099_s8  ;;  %s4993_s10 = smul.u32 24, %s209_s24 }
  0x2a   : > { %s40_s7 = sor.u32 %s39_s12, %s38_s30  ;;  %s4995_s11 = smul.u32 12, %s5422_s21 }
  0x2b   : > { %p41_p9 = scmp.eq.s32.totalorder %s40_s7, 0  ;;  %p5024_p10 = pnand %p5034_p7, %p52_p5 }
  0x2c   : > { %s218_s26 = sadd.s32 %s4995_s11, %s4994_s29  ;;  %s213_s14 = scalar_lea.vmem [#allocation3], %s4993_s10 }
  0x2d   : > { %s5581_s13 = scalar_select %p41_p9, %s5406_s17, %s43_s23  }
  0x2e   : > { %s223_s1 = sshll.u32 %s213_s14, 4  ;;  %s3691_s2 = sshll.u32 %s218_s26, 2  ;;  %s224_s1 = int_to_ptr.vmem [resolvable:$true] %s223_s1 }
  0x2f   : > { %s220_s28 = scalar_lea.hbm %s6036_s0, %s3691_s2  ;;  %s210_s20 = scalar_lea.sflag [#allocation4], %s209_s24 }
  0x30   : > { %s221_s15 = sshll.u32 %s220_s28, 4  ;;  %s6066_s8 = smov 4   ;;  %s222_s15 = int_to_ptr.hbm [resolvable:$true] %s221_s15 }
  0x31   : > { %s6067_s12 = smov 64   ;;  %235 = sbr.rel (%p5528_p8) target bundleno = 1234 (0x4d2), region = 36 }
  0x32   : > { %5026 = dma.hbm_to_vmem [thread:$0]  (!%p5024_p10), %s222_s15, 384, %s224_s1, %s210_s20, %s6067_s12, %s6067_s12, %s6066_s8  }
  0x33   : > { %s5592_s23 = sand.u32 (!%p5528_p8), 1, %s5402_s16  }
  0x34   : > { %s4996_s14 = smul.u32 (!%p5528_p8), 24, %s5592_s23  ;;  %s238_s29 = scalar_lea.sflag (!%p5528_p8), [#allocation4], %s5592_s23 }
  0x36   : > { %s5596_s3 = scalar_lea.vmem [#allocation3], %s4996_s14 }
  0x37   : > { %5374 = dma.done.wait (%p5515_p4), %s238_s29, 384  }
  0x38   : > { %5376 = vsyncadd (%p5515_p4), %s238_s29, 4294966912 }
  0x39   : > { %5378 = dma.done.wait (%p5505_p1), [#allocation7], 25728  }
  0x3a   : > { %5380 = vsyncadd (%p5505_p1), [#allocation7], 4294941568 }
  0x3b   : > { %5382 = dma.done.wait (%p5505_p1), [#allocation10], 128  }
  0x3c   : > { %5384 = vsyncadd (%p5505_p1), [#allocation10], 4294967168  ;;  %v5433_v0 = vmov 0   ;;  %v4560_v1 = vld [vmem:[#allocation6 + $0x78] sm:$0xff]  ;;  %v4559_v3 = vld [vmem:[#allocation6 + $0x70] sm:$0xff]  ;;  %vm506_vm2 = vcmask 1044480  }
  0x3d   : > { %285 = vst [vmem:[#allocation2 + $0x4] sm:$0xf] %v5433_v0  ;;  %v4568_v2 = vld [vmem:[#allocation6 + $0xb8] sm:$0xff]  ;;  %479 = vmatpush.bf16.msra.mxu0 %v4560_v1  ;;  %4962 = vmatpush.bf16.msra.mxu1 %v4560_v1  ;;  %v4567_v5 = vld [vmem:[#allocation6 + $0xb0] sm:$0xff]  ;;  %v4558_v9 = vld [vmem:[#allocation6 + $0x68] sm:$0xff]  ;;  %vm860_vm3 = vcmask 1046528  }
  0x3e   : > { %286 = vst [vmem:[#allocation2 + $0x20] sm:$0xf] %v5433_v0  ;;  %v4578_v4 = vld [vmem:[#allocation6 + $0xf8] sm:$0xff]  ;;  %659 = vmatpush.bf16.msra.mxu2 %v4568_v2  ;;  %v4577_v6 = vld [vmem:[#allocation6 + $0xf0] sm:$0xff]  ;;  %v4566_v10 = vld [vmem:[#allocation6 + $0xa8] sm:$0xff]  ;;  %s3697_s1 = sshll.u32 %s5410_s18, 4 }
  0x3f   : > { %810 = vmatpush.bf16.msra.mxu3 %v4578_v4  ;;  %v288_v7 = vld [vmem:[%s5596_s3] sm:$0xff]   ;;  %v290_v8 = vld [vmem:[%s5596_s3 + $0x8] sm:$0xff]   ;;  %v292_v12 = vld [vmem:[%s5596_s3 + $0x10] sm:$0xff]   ;;  %vm392_vm0 = vsmask.f32 4352  ;;  %s3698_s2 = sadd.s32 4294967280, %s3697_s1 }
  0x40   : > { %294 = vst [vmem:[#allocation2 + $0x8] sm:$0xff] %v288_v7   ;;  %v4576_v11 = vld [vmem:[#allocation6 + $0xe8] sm:$0xff]  ;;  %v4557_v13 = vld [vmem:[#allocation6 + $0x60] sm:$0xff]  ;;  %v4556_v18 = vld [vmem:[#allocation6 + $0x58] sm:$0xff]  ;;  %vm730_vm1 = vsmask.f32 7424 }
  0x41   : > { %480 = vmatpush.bf16.msra.mxu0 %v4559_v3  ;;  %4963 = vmatpush.bf16.msra.mxu1 %v4559_v3  ;;  %296 = vst [vmem:[#allocation2 + $0x10] sm:$0xff] %v290_v8   ;;  %v4565_v14 = vld [vmem:[#allocation6 + $0xa0] sm:$0xff]  ;;  %v4564_v23 = vld [vmem:[#allocation6 + $0x98] sm:$0xff]  ;;  %v4555_v31 = vld [vmem:[#allocation6 + $0x50] sm:$0xff]  ;;  %s4540_s15 = sshll.u32 %s5410_s18, 1  ;;  %s4541_s20 = sshll.u32 %s5414_s19, 2 }
  0x42   : > { %660 = vmatpush.bf16.msra.mxu2 %v4567_v5  ;;  %298 = vst [vmem:[#allocation2 + $0x18] sm:$0xff] %v292_v12   ;;  %v4575_v16 = vld [vmem:[#allocation6 + $0xe0] sm:$0xff]  ;;  %v4574_v26 = vld [vmem:[#allocation6 + $0xd8] sm:$0xff]  ;;  %v4563_v36 = vld [vmem:[#allocation6 + $0x90] sm:$0xff]  ;;  %s3559_s25 = sadd.s32 %s4541_s20, %s4540_s15  ;;  %s3696_s27 = sshll.u32 %s5592_s23, 4 }
  0x43   : > { %811 = vmatpush.bf16.msra.mxu3 %v4577_v6  ;;  %v4573_v39 = vld [vmem:[#allocation6 + $0xd0] sm:$0xff]  ;;  %v4554_v46 = vld [vmem:[#allocation6 + $0x48] sm:$0xff]  ;;  %v4553_v59 = vld [vmem:[#allocation6 + $0x40] sm:$0xff]  ;;  %s4542_s28 = sshll.u32 %s3559_s25, 3  ;;  %s281_s18 = scalar_lea.vmem [#allocation11], %s3696_s27 }
  0x44   : > { %v4919_v15 = vld [vmem:[#allocation2 + $0x4] sm:$0x8]  ;;  %v4552_v63 = vld [vmem:[#allocation6 + $0x38] sm:$0xff]  ;;  %v4561_v1 = vld [vmem:[#allocation6 + $0x80] sm:$0xff]  ;;  %s3561_s8 = scalar_lea.hbm %s6040_s4, %s4542_s28  ;;  %s3562_s19 = sshll.u32 %s281_s18, 4  ;;  %s3563_s19 = int_to_ptr.vmem [resolvable:$true] %s3562_s19 }
  0x45   : > { %481 = vmatpush.bf16.msra.mxu0 %v4558_v9  ;;  %4964 = vmatpush.bf16.msra.mxu1 %v4558_v9  ;;  %v4562_v53 = vld [vmem:[#allocation6 + $0x88] sm:$0xff]  ;;  %v4586_v0 = vld [vmem:[#allocation6 + $0x138] sm:$0xff]  ;;  %v4571_v2 = vld [vmem:[#allocation6 + $0xc0] sm:$0xff]  ;;  %s3564_s24 = sshll.u32 %s3561_s8, 4  ;;  %s3548_s30 = scalar_lea.sflag [#allocation5], %s5592_s23  ;;  %s3565_s24 = int_to_ptr.hbm [resolvable:$true] %s3564_s24 }
  0x46   : > { %661 = vmatpush.bf16.msra.mxu2 %v4566_v10  ;;  %v4572_v54 = vld [vmem:[#allocation6 + $0xc8] sm:$0xff]  ;;  %v4551_v7 = vld [vmem:[#allocation6 + $0x30] sm:$0xff]  ;;  %s5327_s7 = sshra.s32 %s3565_s24, 4  ;;  %s5333_s12 = scalar_lea.hbm %s6040_s4, 128  ;;  %s5328_s7 = int_to_ptr.hbm [resolvable:$true] %s5327_s7 }
  0x47   : > { %812 = vmatpush.bf16.msra.mxu3 %v4576_v11  ;;  %v4979_v17 = vld [vmem:[#allocation2 + $0x4] sm:$0xf0]   ;;  %v4550_v10 = vld [vmem:[#allocation6 + $0x28] sm:$0xff]  ;;  %s5329_s10 = scalar_lea.hbm %s5328_s7, 16  ;;  %p5334_p8 = scmp.lt.s32.totalorder %s5328_s7, %s6040_s4 }
  0x48   : > { %v5613_v19 = vld [vmem:[#allocation2 + $0xc] sm:$0xff]   ;;  %v5615_v20 = vor.u32 %v4979_v17, %v4919_v15  ;;  %v5394_v22 = vld [vmem:[#allocation2 + $0x14] sm:$0xf]  ;;  %v4584_v11 = vld [vmem:[#allocation6 + $0x128] sm:$0xff]  ;;  %p5330_p1 = scmp.ne.s32.totalorder %s5328_s7, %s5329_s10  ;;  %p5335_p11 = scmp.lt.s32.totalorder %s5333_s12, %s5329_s10 }
  0x49   : > { %482 = vmatpush.bf16.msra.mxu0 %v4557_v13  ;;  %4965 = vmatpush.bf16.msra.mxu1 %v4557_v13  ;;  %v5617_v21 = vld [vmem:[#allocation2 + $0x10] sm:$0xff]   ;;  %v5621_v27 = vld [vmem:[#allocation2 + $0x18] sm:$0xff]   ;;  %v5624_v30 = vld [vmem:[#allocation2 + $0x8] sm:$0xff]   ;;  %v402_v32 = vshrl.u32 %v5613_v19, 16  ;;  %v405_v33 = vshll.u32 %v5613_v19, 16 }
  0x4a   : > { %662 = vmatpush.bf16.msra.mxu2 %v4565_v14  ;;  %v394_v24 = vshrl.u32 %v5615_v20, 16  ;;  %v397_v25 = vshll.u32 %v5615_v20, 16  ;;  %v5395_v28 = vld [vmem:[#allocation2 + $0x14] sm:$0xf0]   ;;  %v387_v29 = vunpack.c.h.b16 %v5621_v27  ;;  %v734_v40 = vshll.u32 %v5624_v30, 16  ;;  %v5633_v45 = vld [vmem:[#allocation2 + $0x10] sm:$0xff]  ;;  %p5331_p2 = pnand %p5330_p1, %p5568_p3  ;;  %p5336_p12 = por %p5335_p11, %p5334_p8 }
  0x4b   : > { %813 = vmatpush.bf16.msra.mxu3 %v4575_v16  ;;  %v5628_v34 = vor.u32 %v5395_v28, %v5394_v22  ;;  %v404_v47 = vrot.slane %v402_v32, 3  ;;  %v407_v48 = vrot.slane %v405_v33, 4  ;;  %v732_v56 = vshrl.u32 %v5624_v30, 16  ;;  %v4585_v8 = vld [vmem:[#allocation6 + $0x130] sm:$0xff]  ;;  %v5641_v12 = vld [vmem:[#allocation2 + $0x18] sm:$0xff]  ;;  %v4548_v17 = vld [vmem:[#allocation6 + $0x18] sm:$0xff] }
  0x4c   : > { %v391_v35 = vpack.c.b16 %v387_v29, %v387_v29  ;;  %v396_v37 = vrot.slane %v394_v24, 3  ;;  %v399_v38 = vrot.slane %v397_v25, 4  ;;  %v736_v57 = vrot.slane %v734_v40, 1  ;;  %v4549_v13 = vld [vmem:[#allocation6 + $0x20] sm:$0xff]  ;;  %v695_v25 = vld [vmem:[#allocation2 + $0x20] sm:$0x1]  ;;  %p5332_p4 = pneg %p5331_p2 }
  0x4d   : > { %483 = vmatpush.bf16.msra.mxu0 %v4556_v18  ;;  %4966 = vmatpush.bf16.msra.mxu1 %v4556_v18  ;;  %v411_v41 = vshrl.u32 %v5628_v34, 16  ;;  %v414_v42 = vshll.u32 %v5628_v34, 16  ;;  %v739_v58 = vshll.u32 %v5633_v45, 16  ;;  %v408_v60 = vor.u32 %v407_v48, %v404_v47  ;;  %v4583_v14 = vld [vmem:[#allocation6 + $0x120] sm:$0xff]  ;;  %v4582_v18 = vld [vmem:[#allocation6 + $0x118] sm:$0xff]  ;;  %v4581_v28 = vld [vmem:[#allocation6 + $0x110] sm:$0xff] }
  0x4e   : > { %663 = vmatpush.bf16.msra.mxu2 %v4564_v23  ;;  %v420_v43 = vshrl.u32 %v391_v35, 16  ;;  %v423_v44 = vshll.u32 %v391_v35, 16  ;;  %v400_v55 = vor.u32 %v399_v38, %v396_v37  ;;  %v737_v3 = vor.u32 %v736_v57, %v732_v56  ;;  %v4580_v32 = vld [vmem:[#allocation6 + $0x108] sm:$0xff]  ;;  %v4878_v33 = vld [vmem:[#allocation2 + $0x8] sm:$0xf0]  ;;  %v4545_v38 = vld [vmem:[#allocation6] sm:$0xff]  ;;  %p5337_p13 = pnand %p5336_p12, %p5332_p4 }
  0x4f   : > { %814 = vmatpush.bf16.msra.mxu3 %v4574_v26  ;;  %v413_v49 = vrot.slane %v411_v41, 3  ;;  %v416_v50 = vrot.slane %v414_v42, 4  ;;  %v741_v4 = vrot.slane %v739_v58, 1  ;;  %v743_v15 = vshrl.u32 %v5633_v45, 16  ;;  %v4547_v26 = vld [vmem:[#allocation6 + $0x10] sm:$0xff]  ;;  %v4579_v41 = vld [vmem:[#allocation6 + $0x100] sm:$0xff] }
  0x50   : > { %v422_v51 = vrot.slane %v420_v43, 3  ;;  %v425_v52 = vrot.slane %v423_v44, 4  ;;  %v409_v5 = vsel %vm392_vm0, %v400_v55, %v408_v60  ;;  %v747_v16 = vshll.u32 %v5641_v12, 16  ;;  %v4879_v35 = vld [vmem:[#allocation2 + $0x8] sm:$0xe] }
  0x51   : > { %484 = vmatpush.bf16.msra.mxu0 %v4555_v31  ;;  %4967 = vmatpush.bf16.msra.mxu1 %v4555_v31  ;;  %v417_v61 = vor.u32 %v416_v50, %v413_v49  ;;  %v742_v9 = vsel %vm730_vm1, %v737_v3, %v741_v4  ;;  %v745_v22 = vor.u32 %v743_v15, %v741_v4  ;;  %v4546_v31 = vld [vmem:[#allocation6 + $0x8] sm:$0xff]  ;;  %v508_v40 = vrot.slane %v5613_v19, 3  ;;  %v4609_v58 = vld [vmem:[#allocation6 + $0x1f0] sm:$0xff] }
  0x52   : > { %664 = vmatpush.bf16.msra.mxu2 %v4563_v36  ;;  %v426_v62 = vor.u32 %v425_v52, %v422_v51  ;;  %v749_v23 = vrot.slane %v747_v16, 1  ;;  %v4880_v37 = vor.u32 %v4879_v35, %v4878_v33  ;;  %v751_v42 = vshrl.u32 %v5641_v12, 16  ;;  %v340_v51 = vld [vmem:[#allocation2 + $0x1c] sm:$0x7]  ;;  %v4604_v3 = vld [vmem:[#allocation6 + $0x1c8] sm:$0xff] }
  0x53   : > { %815 = vmatpush.bf16.msra.mxu3 %v4573_v39  ;;  %v418_v24 = vsel %vm392_vm0, %v408_v60, %v417_v61  ;;  %v507_v39 = vrot.slane %v5615_v20, 3  ;;  %v510_v49 = vrot.slane %v5628_v34, 3  ;;  %v4610_v34 = vld [vmem:[#allocation6 + $0x1f8] sm:$0xff]  ;;  %v4608_v60 = vld [vmem:[#allocation6 + $0x1e8] sm:$0xff]  ;;  %v4617_v35 = vld [vmem:[#allocation6 + $0x220] sm:$0xff] }
  0x54   : > { %v427_v6 = vsel %vm392_vm0, %v417_v61, %v426_v62  ;;  %v750_v29 = vsel %vm730_vm1, %v745_v22, %v749_v23  ;;  %v861_v44 = vrot.slane %v4880_v37, 1  ;;  %v753_v47 = vor.u32 %v751_v42, %v749_v23  ;;  %v4607_v61 = vld [vmem:[#allocation6 + $0x1e0] sm:$0xff] }
  0x55   : > { %485 = vmatpush.bf16.msra.mxu0 %v4554_v46  ;;  %4968 = vmatpush.bf16.msra.mxu1 %v4554_v46  ;;  %v862_v46 = vrot.slane %v5633_v45, 1  ;;  %v864_v45 = vrot.slane %v5641_v12, 1  ;;  %v511_v50 = vsel %vm506_vm2, %v508_v40, %v510_v49  ;;  %v4593_v12 = vld [vmem:[#allocation6 + $0x170] sm:$0xff]  ;;  %v4599_v37 = vld [vmem:[#allocation6 + $0x1a0] sm:$0xff] }
  0x56   : > { %665 = vmatpush.bf16.msra.mxu2 %v4562_v53  ;;  %v504_v53 = vunpack.c.l.b16 %v340_v51 }
  0x57   : > { %816 = vmatpush.bf16.msra.mxu3 %v4572_v54  ;;  %v863_v20 = vsel %vm860_vm3, %v861_v44, %v862_v46  ;;  %v865_v52 = vsel %vm860_vm3, %v862_v46, %v864_v45  ;;  %v4616_v46 = vld [vmem:[#allocation6 + $0x218] sm:$0xff] }
  0x58   : > { %v505_v54 = vpack.c.b16 %v504_v53, %v504_v53 }
  0x59   : > { %486 = vmatpush.bf16.msra.mxu0 %v4553_v59  ;;  %4969 = vmatpush.bf16.msra.mxu1 %v4553_v59 }
  0x5a   : > { %666 = vmatpush.bf16.msra.mxu2 %v4561_v1  ;;  %v512_v55 = vrot.slane %v505_v54, 3  ;;  %v4605_v1 = vld [vmem:[#allocation6 + $0x1d0] sm:$0xff] }
  0x5b   : > { %817 = vmatpush.bf16.msra.mxu3 %v4571_v2 }
  0x5c   : > { %487 = vmatmul.bf16.vlgmr.msra.gmra.mxu0 %v409_v5  ;;  %497 = vmatmul.bf16.vlgmr.msra.gmra.mxu1 %v427_v6  ;;  %v513_v57 = vsel %vm506_vm2, %v510_v49, %v512_v55  ;;  %v4589_v49 = vld [vmem:[#allocation6 + $0x150] sm:$0xff] }
  0x5d   : > { %565 = vmatpush.bf16.msrb.mxu1 %v4552_v63  ;;  %919 = vmatpush.bf16.msrb.mxu0 %v4586_v0  ;;  %v4606_v0 = vld [vmem:[#allocation6 + $0x1d8] sm:$0xff] }
  0x5e   : > { %667 = vmatmul.bf16.vlgmr.msra.gmra.mxu2 %v5624_v30  ;;  %818 = vmatmul.bf16.vlgmr.msra.gmra.mxu3 %v742_v9  ;;  %v725_v30 = vunpack.c.l.b16 %v695_v25  ;;  %v4618_v25 = vld [vmem:[#allocation6 + $0x228] sm:$0xff] }
  0x5f   : > { %1325 = vmatpush.bf16.msrb.mxu3 %v4610_v34 }
  0x60   : > { %v729_v36 = vpack.c.b16 %v725_v30, %v725_v30 }
  0x61   : > { %566 = vmatpush.bf16.msrb.mxu1 %v4551_v7  ;;  %920 = vmatpush.bf16.msrb.mxu0 %v4585_v8  ;;  %v4594_v7 = vld [vmem:[#allocation6 + $0x178] sm:$0xff]  ;;  %v4603_v8 = vld [vmem:[#allocation6 + $0x1c0] sm:$0xff] }
  0x62   : > { %v755_v43 = vshll.u32 %v729_v36, 16  ;;  %v866_v56 = vrot.slane %v729_v36, 1  ;;  %1231 = vmatpush.bf16.msrb.mxu2 %v4594_v7  ;;  %v4613_v7 = vld [vmem:[#allocation6 + $0x200] sm:$0xff] }
  0x63   : > { %1326 = vmatpush.bf16.msrb.mxu3 %v4609_v58 }
  0x64   : > { %v757_v48 = vrot.slane %v755_v43, 1 }
  0x65   : > { %567 = vmatpush.bf16.msrb.mxu1 %v4550_v10  ;;  %921 = vmatpush.bf16.msrb.mxu0 %v4584_v11  ;;  %v4620_v10 = vld [vmem:[#allocation6 + $0x238] sm:$0xff] }
  0x66   : > { %v758_v19 = vsel %vm730_vm1, %v753_v47, %v757_v48  ;;  %v4602_v11 = vld [vmem:[#allocation6 + $0x1b8] sm:$0xff]  ;;  %1232 = vmatpush.bf16.msrb.mxu2 %v4593_v12  ;;  %v5678_v47 = vstv %s3698_s2  ;;  %v4595_v12 = vld [vmem:[#allocation6 + $0x180] sm:$0xff] }
  0x67   : > { %1327 = vmatpush.bf16.msrb.mxu3 %v4608_v60  ;;  %v4614_v60 = vld [vmem:[#allocation6 + $0x208] sm:$0xff] }
  0x69   : > { %568 = vmatpush.bf16.msrb.mxu1 %v4549_v13  ;;  %922 = vmatpush.bf16.msrb.mxu0 %v4583_v14  ;;  %v4619_v14 = vld [vmem:[#allocation6 + $0x230] sm:$0xff] }
  0x6b   : > { %1328 = vmatpush.bf16.msrb.mxu3 %v4607_v61 }
  0x6c   : > { %492 = vmatmul.bf16.gmra.mxu0 %v418_v24 }
  0x6d   : > { %569 = vmatpush.bf16.msrb.mxu1 %v4548_v17  ;;  %923 = vmatpush.bf16.msrb.mxu0 %v4582_v18  ;;  %v4601_v17 = vld [vmem:[#allocation6 + $0x1b0] sm:$0xff]  ;;  %v4592_v18 = vld [vmem:[#allocation6 + $0x168] sm:$0xff] }
  0x6e   : > { %672 = vmatmul.bf16.gmra.mxu2 %v5617_v21  ;;  %823 = vmatmul.bf16.gmra.mxu3 %v750_v29  ;;  %v509_v21 = vsel %vm506_vm2, %v507_v39, %v508_v40  ;;  %v4591_v29 = vld [vmem:[#allocation6 + $0x160] sm:$0xff]  ;;  %v5674_v40 = vld [vmem:[#allocation9] ss:$0 sm:$0xff] }
  0x6f   : > { %1329 = vmatpush.bf16.msrb.mxu3 %v4606_v0  ;;  %1233 = vmatpush.bf16.msrb.mxu2 %v4592_v18  ;;  %v4596_v0 = vld [vmem:[#allocation6 + $0x188] sm:$0xff] }
  0x71   : > { %570 = vmatpush.bf16.msrb.mxu1 %v4547_v26  ;;  %924 = vmatpush.bf16.msrb.mxu0 %v4581_v28  ;;  %v4600_v28 = vld [vmem:[#allocation6 + $0x1a8] sm:$0xff] }
  0x73   : > { %1330 = vmatpush.bf16.msrb.mxu3 %v4605_v1  ;;  %1234 = vmatpush.bf16.msrb.mxu2 %v4591_v29  ;;  %v4587_v1 = vld [vmem:[#allocation6 + $0x140] sm:$0xff] }
  0x75   : > { %571 = vmatpush.bf16.msrb.mxu1 %v4546_v31  ;;  %925 = vmatpush.bf16.msrb.mxu0 %v4580_v32  ;;  %v5670_v31 = vld [vmem:[#allocation8] ss:$0 sm:$0xff]  ;;  %v300_v32 = vlaneseq }
  0x77   : > { %1331 = vmatpush.bf16.msrb.mxu3 %v4604_v3  ;;  %v5676_v43 = vshrl.u32 %v300_v32, 7 }
  0x79   : > { %572 = vmatpush.bf16.msrb.mxu1 %v4545_v38  ;;  %926 = vmatpush.bf16.msrb.mxu0 %v4579_v41  ;;  %v4590_v38 = vld [vmem:[#allocation6 + $0x158] sm:$0xff]  ;;  %v302_v48 = vadd.s32 8, %v5676_v43  ;;  %v310_v53 = vadd.s32 %v5678_v47, %v5676_v43 }
  0x7a   : > { %1235 = vmatpush.bf16.msrb.mxu2 %v4590_v38  ;;  %v4627_v38 = vld [vmem:[#allocation6 + $0x270] sm:$0xff] }
  0x7b   : > { %1332 = vmatpush.bf16.msrb.mxu3 %v4603_v8  ;;  %vm316_vm4 = vcmp.ge.s32.totalorder %v310_v53, 0  ;;  %vm322_vm5 = vcmp.lt.s32.totalorder %v310_v53, 24 }
  0x7c   : > { %573 = vmatmul.bf16.vlgmr.msrb.gmra.mxu1 %v509_v21  ;;  %927 = vmatmul.bf16.vlgmr.msrb.gmra.mxu0 %v863_v20  ;;  %vm5688_vm8 = vmand %vm316_vm4, %vm322_vm5 }
  0x7d   : > { %1475 = vmatpush.bf16.msra.mxu0 %v4620_v10  ;;  %1146 = vmatpush.bf16.msra.mxu1 %v4602_v11  ;;  %v4753_v10 = vld [vmem:[#allocation6 + $0x630] sm:$0xff] }
  0x7e   : > { %677 = vmatmul.bf16.gmra.mxu2 %v5621_v27  ;;  %828 = vmatmul.bf16.gmra.mxu3 %v758_v19  ;;  %v867_v27 = vsel %vm860_vm3, %v864_v45, %v866_v56  ;;  %v4598_v19 = vld [vmem:[#allocation6 + $0x198] sm:$0xff]  ;;  %v311_v56 = vadd.s32 %v5678_v47, %v302_v48 }
  0x7f   : > { %1236 = vmatpush.bf16.msrb.mxu2 %v4589_v49 }
  0x80   : > { %vm317_vm6 = vcmp.ge.s32.totalorder %v311_v56, 0  ;;  %vm323_vm7 = vcmp.lt.s32.totalorder %v311_v56, 24 }
  0x81   : > { %1476 = vmatpush.bf16.msra.mxu0 %v4619_v14  ;;  %1147 = vmatpush.bf16.msra.mxu1 %v4601_v17  ;;  %vm5692_vm9 = vmand %vm317_vm6, %vm323_vm7 }
  0x82   : > { %vm5712_vm10 = vmpackc.low %vm5692_vm9, %vm5688_vm8 }
  0x85   : > { %1477 = vmatpush.bf16.msra.mxu0 %v4618_v25  ;;  %1148 = vmatpush.bf16.msra.mxu1 %v4600_v28 }
  0x89   : > { %1478 = vmatpush.bf16.msra.mxu0 %v4617_v35  ;;  %1149 = vmatpush.bf16.msra.mxu1 %v4599_v37 }
  0x8c   : > { %578 = vmatmul.bf16.gmra.mxu1 %v511_v50  ;;  %932 = vmatmul.bf16.gmra.mxu0 %v865_v52  ;;  %v4615_v52 = vld [vmem:[#allocation6 + $0x210] sm:$0xff] }
  0x8d   : > { %1479 = vmatpush.bf16.msra.mxu0 %v4616_v46  ;;  %1150 = vmatpush.bf16.msra.mxu1 %v4598_v19 }
  0x91   : > { %1480 = vmatpush.bf16.msra.mxu0 %v4615_v52 }
  0x95   : > { %1481 = vmatpush.bf16.msra.mxu0 %v4614_v60 }
  0x99   : > { %1482 = vmatpush.bf16.msra.mxu0 %v4613_v7 }
  0x9c   : > { %583 = vmatmul.bf16.gmra.mxu1 %v513_v57  ;;  %937 = vmatmul.bf16.gmra.mxu0 %v867_v27  ;;  %v4597_v57 = vld [vmem:[#allocation6 + $0x190] sm:$0xff]  ;;  %v4588_v27 = vld [vmem:[#allocation6 + $0x148] sm:$0xff] }
  0x9d   : > { %1151 = vmatpush.bf16.msra.mxu1 %v4597_v57  ;;  %1237 = vmatpush.bf16.msrb.mxu2 %v4588_v27  ;;  %v4928_v57 = vld [vmem:[#allocation2 + $0x4] sm:$0x8] }
  0xa1   : > { %1152 = vmatpush.bf16.msra.mxu1 %v4596_v0  ;;  %1238 = vmatpush.bf16.msrb.mxu2 %v4587_v1 }
  0xa5   : > { %1153 = vmatpush.bf16.msra.mxu1 %v4595_v12 }
  0xd9   : > { %v488_v59 = vpop.f32.mrf.mxu0  ;;  %v5662_v63 = vpop.f32.mrf.mxu1 }
  0xe1   : > { %v490_v62 = vpop.f32.mrf.mxu0  ;;  %v5666_v4 = vpop.f32.mrf.mxu1 }
  0xe2   : > { %v668_v5 = vpop.f32.mrf.mxu2  ;;  %v819_v6 = vpop.f32.mrf.mxu3 }
  0xe9   : > { %v5664_v2 = vpop.f32.mrf.mxu0 }
  0xea   : > { %v670_v16 = vpop.f32.mrf.mxu2  ;;  %v821_v24 = vpop.f32.mrf.mxu3 }
  0xf1   : > { %v5668_v9 = vpop.f32.mrf.mxu0 }
  0xf2   : > { %v673_v44 = vpop.f32.mrf.mxu2  ;;  %v824_v20 = vpop.f32.mrf.mxu3 }
  0xf9   : > { %v574_v13 = vpop.f32.mrf.mxu1  ;;  %v928_v23 = vpop.f32.mrf.mxu0 }
  0xfa   : > { %v575_v15 = vadd.f32 %v574_v13, %v488_v59 }
  0xfc   : > { %v683_v22 = vadd.f32 %v668_v5, %v575_v15  ;;  %v826_v5 = vpop.f32.mrf.mxu3 }
  0xfe   : > { %v834_v26 = vadd.f32 %v819_v6, %v683_v22 }
 0x100   : > { %v943_v30 = vadd.f32 %v928_v23, %v834_v26  ;;  %v303_v23 = vadd.s32 16, %v5676_v43 }
 0x101   : > { %v576_v33 = vpop.f32.mrf.mxu1  ;;  %v930_v42 = vpop.f32.mrf.mxu0 }
 0x102   : > { %v577_v36 = vadd.f32 %v576_v33, %v490_v62  ;;  %v951_v39 = vmul.f32 %v5670_v31, %v943_v30  ;;  %v675_v62 = vpop.f32.mrf.mxu2  ;;  %v4628_v30 = vld [vmem:[#allocation6 + $0x278] sm:$0xff]  ;;  %v312_v35 = vadd.s32 %v5678_v47, %v303_v23 }
 0x103   : > { %1583 = vmatpush.bf16.msrb.mxu1 %v4628_v30 }
 0x104   : > { %v684_v41 = vadd.f32 %v670_v16, %v577_v36  ;;  %v959_v45 = vadd.f32 %v5674_v40, %v951_v39  ;;  %vm318_vm11 = vcmp.ge.s32.totalorder %v312_v35, 0  ;;  %vm324_vm12 = vcmp.lt.s32.totalorder %v312_v35, 24 }
 0x105   : > { %vm5723_vm15 = vmand %vm318_vm11, %vm324_vm12 }
 0x106   : > { %v835_v21 = vadd.f32 %v821_v24, %v684_v41  ;;  %5121 = vtanh.f32 %v959_v45  ;;  %v829_v41 = vpop.f32.mrf.mxu3 }
 0x107   : > { %1584 = vmatpush.bf16.msrb.mxu1 %v4627_v38 }
 0x108   : > { %v944_v50 = vadd.f32 %v930_v42, %v835_v21 }
 0x109   : > { %v579_v51 = vpop.f32.mrf.mxu1  ;;  %v933_v59 = vpop.f32.mrf.mxu0 }
 0x10a   : > { %v952_v54 = vmul.f32 %v5670_v31, %v944_v50  ;;  %v580_v55 = vadd.f32 %v579_v51, %v5664_v2  ;;  %v678_v32 = vpop.f32.mrf.mxu2 }
 0x10c   : > { %v960_v34 = vadd.f32 %v5674_v40, %v952_v54  ;;  %v685_v58 = vadd.f32 %v673_v44, %v580_v55  ;;  %v5122_v8 = vpop.eup %5121 }
 0x10d   : > { %v983_v17 = vsel %vm5688_vm8, %v5122_v8, 0.0 }
 0x10e   : > { %5123 = vtanh.f32 %v960_v34  ;;  %v836_v61 = vadd.f32 %v824_v20, %v685_v58  ;;  %v831_v56 = vpop.f32.mrf.mxu3  ;;  %v305_v58 = vadd.s32 32, %v5676_v43 }
 0x110   : > { %v945_v2 = vadd.f32 %v933_v59, %v836_v61  ;;  %v4626_v61 = vld [vmem:[#allocation6 + $0x268] sm:$0xff] }
 0x111   : > { %v581_v6 = vpop.f32.mrf.mxu1  ;;  %v935_v16 = vpop.f32.mrf.mxu0  ;;  %1585 = vmatpush.bf16.msrb.mxu1 %v4626_v61  ;;  %v1361_v61 = vld [vmem:[#allocation2 + $0x20] sm:$0x1] }
 0x112   : > { %v582_v11 = vadd.f32 %v581_v6, %v5668_v9  ;;  %v953_v14 = vmul.f32 %v5670_v31, %v945_v2  ;;  %v304_v9 = vadd.s32 24, %v5676_v43  ;;  %v680_v50 = vpop.f32.mrf.mxu2 }
 0x114   : > { %v5124_v13 = vpop.eup %5123  ;;  %v686_v15 = vadd.f32 %v675_v62, %v582_v11  ;;  %v961_v25 = vadd.f32 %v5674_v40, %v953_v14  ;;  %v313_v39 = vadd.s32 %v5678_v47, %v304_v9  ;;  %v4625_v11 = vld [vmem:[#allocation6 + $0x260] sm:$0xff] }
 0x115   : > { %v984_v18 = vsel %vm5692_vm9, %v5124_v13, 0.0  ;;  %v5170_v29 = vpack.c.bf16 %v5124_v13, %v5122_v8  ;;  %1586 = vmatpush.bf16.msrb.mxu1 %v4625_v11 }
 0x116   : > { %v5702_v22 = vpack.c.bf16 %v984_v18, %v983_v17  ;;  %v837_v24 = vadd.f32 %v826_v5, %v686_v15  ;;  %5125 = vtanh.f32 %v961_v25  ;;  %vm319_vm13 = vcmp.ge.s32.totalorder %v313_v39, 0  ;;  %v4624_v15 = vld [vmem:[#allocation6 + $0x258] sm:$0xff] }
 0x117   : > { %5171 = vmatmul.msk.bf16.vlgmr.msrb.gmra.mxu3 %vm5712_vm10, %v5170_v29  ;;  %vm325_vm14 = vcmp.lt.s32.totalorder %v313_v39, 24  ;;  %v314_v5 = vadd.s32 %v5678_v47, %v305_v58 }
 0x118   : > { %4881 = vst [vmem:[#allocation2 + $0x8] sm:$0xff] %v5702_v22   ;;  %v946_v26 = vadd.f32 %v935_v16, %v837_v24  ;;  %vm5727_vm4 = vmand %vm319_vm13, %vm325_vm14  ;;  %v1399_v7 = vshll.u32 %v5702_v22, 16 }
 0x119   : > { %v584_v33 = vpop.f32.mrf.mxu1  ;;  %v938_v46 = vpop.f32.mrf.mxu0  ;;  %vm5747_vm5 = vmpackc.low %vm5727_vm4, %vm5723_vm15  ;;  %vm320_vm6 = vcmp.ge.s32.totalorder %v314_v5, 0  ;;  %vm326_vm7 = vcmp.lt.s32.totalorder %v314_v5, 24  ;;  %1587 = vmatpush.bf16.msrb.mxu1 %v4624_v15  ;;  %v1391_v5 = vunpack.c.l.b16 %v1361_v61 }
 0x11a   : > { %v954_v36 = vmul.f32 %v5670_v31, %v946_v26  ;;  %v585_v37 = vadd.f32 %v584_v33, %v5662_v63  ;;  %v1401_v16 = vrot.slane %v1399_v7, 1  ;;  %vm5761_vm13 = vmand %vm320_vm6, %vm326_vm7 }
 0x11c   : > { %v962_v42 = vadd.f32 %v5674_v40, %v954_v36  ;;  %v687_v44 = vadd.f32 %v678_v32, %v585_v37  ;;  %v5126_v19 = vpop.eup %5125 }
 0x11d   : > { %v985_v54 = vsel %vm5723_vm15, %v5126_v19, 0.0 }
 0x11e   : > { %5127 = vtanh.f32 %v962_v42  ;;  %v838_v21 = vadd.f32 %v829_v41, %v687_v44 }
 0x11f   : > { %v4982_v27 = vld [vmem:[#allocation2 + $0x4] sm:$0xf0]  }
 0x120   : > { %v947_v48 = vadd.f32 %v938_v46, %v838_v21 }
 0x121   : > { %v586_v20 = vpop.f32.mrf.mxu1  ;;  %v940_v60 = vpop.f32.mrf.mxu0 }
 0x122   : > { %v587_v45 = vadd.f32 %v586_v20, %v5666_v4  ;;  %v955_v52 = vmul.f32 %v5670_v31, %v947_v48  ;;  %v306_v4 = vadd.s32 40, %v5676_v43  ;;  %v4929_v43 = vor.u32 %v4982_v27, %v4928_v57  ;;  %v4623_v20 = vld [vmem:[#allocation6 + $0x250] sm:$0xff] }
 0x123   : > { %1588 = vmatpush.bf16.msrb.mxu1 %v4623_v20  ;;  %v4651_v20 = vld [vmem:[#allocation6 + $0x330] sm:$0xff] }
 0x124   : > { %v5128_v51 = vpop.eup %5127  ;;  %v688_v53 = vadd.f32 %v680_v50, %v587_v45  ;;  %v963_v62 = vadd.f32 %v5674_v40, %v955_v52  ;;  %v315_v8 = vadd.s32 %v5678_v47, %v306_v4  ;;  %v1061_v13 = vshrl.u32 %v4929_v43, 16  ;;  %v4621_v45 = vld [vmem:[#allocation6 + $0x240] sm:$0xff] }
 0x125   : > { %v986_v55 = vsel %vm5727_vm4, %v5128_v51, 0.0  ;;  %v5173_v2 = vpack.c.bf16 %v5128_v51, %v5126_v19  ;;  %v1064_v14 = vshll.u32 %v4929_v43, 16  ;;  %v1173_v18 = vrot.slane %v4929_v43, 3  ;;  %v4622_v19 = vld [vmem:[#allocation6 + $0x248] sm:$0xff] }
 0x126   : > { %v5737_v34 = vpack.c.bf16 %v986_v55, %v985_v54  ;;  %v839_v59 = vadd.f32 %v831_v56, %v688_v53  ;;  %5129 = vtanh.f32 %v963_v62  ;;  %vm321_vm11 = vcmp.ge.s32.totalorder %v315_v8, 0 }
 0x127   : > { %5174 = vmatmul.msk.bf16.gmra.mxu3 %vm5747_vm5, %v5173_v2  ;;  %vm327_vm12 = vcmp.lt.s32.totalorder %v315_v8, 24  ;;  %v1397_v47 = vshrl.u32 %v5702_v22, 16  ;;  %v1063_v23 = vrot.slane %v1061_v13, 3  ;;  %v1066_v24 = vrot.slane %v1064_v14, 4  ;;  %1589 = vmatpush.bf16.msrb.mxu1 %v4622_v19 }
 0x128   : > { %4882 = vst [vmem:[#allocation2 + $0x10] sm:$0xff] %v5737_v34   ;;  %v948_v0 = vadd.f32 %v940_v60, %v839_v59  ;;  %vm5767_vm14 = vmand %vm321_vm11, %vm327_vm12  ;;  %v4789_v52 = vunpack.c.h.b16 %v5737_v34 }
 0x129   : > { %v1402_v33 = vor.u32 %v1401_v16, %v1397_v47  ;;  %v1067_v39 = vor.u32 %v1066_v24, %v1063_v23 }
 0x12a   : > { %v956_v6 = vmul.f32 %v5670_v31, %v948_v0 }
 0x12b   : > { %1590 = vmatpush.bf16.msrb.mxu1 %v4621_v45  ;;  %v4649_v45 = vld [vmem:[#allocation6 + $0x320] sm:$0xff] }
 0x12c   : > { %v964_v12 = vadd.f32 %v5674_v40, %v956_v6  ;;  %v5130_v30 = vpop.eup %5129 }
 0x12d   : > { %v987_v41 = vsel %vm5761_vm13, %v5130_v30, 0.0 }
 0x12e   : > { %5131 = vtanh.f32 %v964_v12  ;;  %v1395_v12 = vpack.c.b16 %v1391_v5, %v1391_v5 }
 0x12f   : > { %v4983_v17 = vld [vmem:[#allocation2 + $0xc] sm:$0xff]  }
 0x130   : > { %v5758_v31 = vld [vmem:[#allocation2 + $0x10] sm:$0xff]  ;;  %v1174_v9 = vrot.slane %v4983_v17, 3  ;;  %v1069_v26 = vshrl.u32 %v4983_v17, 16  ;;  %v1072_v29 = vshll.u32 %v4983_v17, 16  ;;  %v1420_v13 = vshll.u32 %v1395_v12, 16 }
 0x131   : > { %v1404_v25 = vshll.u32 %v5758_v31, 16  ;;  %v1408_v55 = vshrl.u32 %v5758_v31, 16 }
 0x132   : > { %v1175_v22 = vsel %vm506_vm2, %v1173_v18, %v1174_v9  ;;  %v1071_v36 = vrot.slane %v1069_v26, 3  ;;  %v1074_v37 = vrot.slane %v1072_v29, 4  ;;  %v1422_v47 = vrot.slane %v1420_v13, 1  ;;  %v4660_v13 = vld [vmem:[#allocation6 + $0x368] sm:$0xff] }
 0x133   : > { %v1406_v35 = vrot.slane %v1404_v25, 1  ;;  %1239 = vmatmul.bf16.vlgmr.msrb.gmra.mxu2 %v1175_v22  ;;  %v4888_v22 = vld [vmem:[#allocation2 + $0x8] sm:$0xe] }
 0x134   : > { %v5132_v38 = vpop.eup %5131  ;;  %v1075_v46 = vor.u32 %v1074_v37, %v1071_v36  ;;  %v1526_v36 = vrot.slane %v5758_v31, 1  ;;  %v4650_v31 = vld [vmem:[#allocation6 + $0x328] sm:$0xff] }
 0x135   : > { %v988_v42 = vsel %vm5767_vm14, %v5132_v38, 0.0  ;;  %v1407_v44 = vsel %vm730_vm1, %v1402_v33, %v1406_v35  ;;  %v1410_v27 = vor.u32 %v1408_v55, %v1406_v35  ;;  %v4887_v33 = vld [vmem:[#allocation2 + $0x8] sm:$0xf0]  ;;  %v4646_v55 = vld [vmem:[#allocation6 + $0x308] sm:$0xff] }
 0x136   : > { %v4780_v21 = vpack.c.bf16 %v988_v42, %v987_v41  ;;  %1483 = vmatmul.bf16.vlgmr.msra.gmra.mxu0 %v1407_v44  ;;  %v1076_v48 = vsel %vm392_vm0, %v1067_v39, %v1075_v46  ;;  %v4889_v35 = vor.u32 %v4888_v22, %v4887_v33  ;;  %v1530_v42 = vrot.slane %v1395_v12, 1 }
 0x137   : > { %1154 = vmatmul.bf16.vlgmr.msra.gmra.mxu1 %v1076_v48  ;;  %v4652_v48 = vld [vmem:[#allocation6 + $0x338] sm:$0xff] }
 0x138   : > { %4883 = vst [vmem:[#allocation2 + $0x18] sm:$0xff] %v4780_v21   ;;  %v1525_v37 = vrot.slane %v4889_v35, 1  ;;  %1977 = vmatpush.bf16.msrb.mxu0 %v4652_v48  ;;  %v4658_v35 = vld [vmem:[#allocation6 + $0x358] sm:$0xff] }
 0x13a   : > { %v1527_v38 = vsel %vm860_vm3, %v1525_v37, %v1526_v36 }
 0x13c   : > { %1978 = vmatpush.bf16.msrb.mxu0 %v4651_v20  ;;  %v4639_v20 = vld [vmem:[#allocation6 + $0x2d0] sm:$0xff] }
 0x13f   : > { %v1006_v50 = vld [vmem:[#allocation2 + $0x18] sm:$0xff]  }
 0x140   : > { %v4612_v51 = vld [vmem:[#allocation2 + $0x18] sm:$0xff]  ;;  %v1054_v53 = vunpack.c.l.b16 %v1006_v50  ;;  %v1055_v54 = vunpack.c.h.b16 %v1006_v50  ;;  %1343 = vmatmul.bf16.gmra.mxu3 %v1006_v50  ;;  %1979 = vmatpush.bf16.msrb.mxu0 %v4650_v31 }
 0x141   : > { %v1412_v56 = vshll.u32 %v4612_v51, 16  ;;  %v1007_v43 = vld [vmem:[#allocation2 + $0x1c] sm:$0x7]  ;;  %v1416_v17 = vshrl.u32 %v4612_v51, 16  ;;  %v1528_v39 = vrot.slane %v4612_v51, 1  ;;  %v4648_v51 = vld [vmem:[#allocation6 + $0x318] sm:$0xff] }
 0x142   : > { %v1058_v57 = vpack.c.b16 %v1054_v53, %v4789_v52  ;;  %v1059_v7 = vpack.c.b16 %v1055_v54, %v1055_v54  ;;  %v1171_v11 = vunpack.c.l.b16 %v1007_v43  ;;  %v4647_v53 = vld [vmem:[#allocation6 + $0x310] sm:$0xff] }
 0x143   : > { %v1414_v58 = vrot.slane %v1412_v56, 1  ;;  %v1529_v41 = vsel %vm860_vm3, %v1526_v36, %v1528_v39  ;;  %v1531_v44 = vsel %vm860_vm3, %v1528_v39, %v1530_v42  ;;  %v4631_v42 = vld [vmem:[#allocation6 + $0x290] sm:$0xff] }
 0x144   : > { %v1176_v59 = vrot.slane %v1058_v57, 3  ;;  %v1078_v4 = vshrl.u32 %v1058_v57, 16  ;;  %v1081_v60 = vshll.u32 %v1058_v57, 16  ;;  %v1172_v14 = vpack.c.b16 %v1171_v11, %v1171_v11  ;;  %1980 = vmatpush.bf16.msrb.mxu0 %v4649_v45 }
 0x145   : > { %v1415_v62 = vsel %vm730_vm1, %v1410_v27, %v1414_v58  ;;  %v1087_v15 = vshrl.u32 %v1059_v7, 16  ;;  %v1090_v16 = vshll.u32 %v1059_v7, 16  ;;  %v1418_v18 = vor.u32 %v1416_v17, %v1414_v58  ;;  %v4636_v27 = vld [vmem:[#allocation6 + $0x2b8] sm:$0xff]  ;;  %v4645_v58 = vld [vmem:[#allocation6 + $0x300] sm:$0xff]  ;;  %v4634_v7 = vld [vmem:[#allocation6 + $0x2a8] sm:$0xff] }
 0x146   : > { %v1177_v0 = vsel %vm506_vm2, %v1174_v9, %v1176_v59  ;;  %1488 = vmatmul.bf16.gmra.mxu0 %v1415_v62  ;;  %v1080_v34 = vrot.slane %v1078_v4, 3  ;;  %v1083_v2 = vrot.slane %v1081_v60, 4  ;;  %v1178_v23 = vrot.slane %v1172_v14, 3  ;;  %1883 = vmatpush.bf16.msra.mxu3 %v4636_v27  ;;  %v4662_v60 = vld [vmem:[#allocation6 + $0x378] sm:$0xff]  ;;  %v4642_v17 = vld [vmem:[#allocation6 + $0x2e8] sm:$0xff] }
 0x147   : > { %1244 = vmatmul.bf16.gmra.mxu2 %v1177_v0  ;;  %v1089_v24 = vrot.slane %v1087_v15, 3  ;;  %v1092_v9 = vrot.slane %v1090_v16, 4  ;;  %v1423_v25 = vsel %vm730_vm1, %v1418_v18, %v1422_v47  ;;  %v4644_v62 = vld [vmem:[#allocation6 + $0x2f8] sm:$0xff]  ;;  %2127 = vmatpush.bf16.msra.mxu1 %v4662_v60  ;;  %v4635_v0 = vld [vmem:[#allocation6 + $0x2b0] sm:$0xff]  ;;  %v5796_v16 = vld [vmem:[#allocation8 + $0x1] ss:$0 sm:$0xff] }
 0x148   : > { %v1084_v6 = vor.u32 %v1083_v2, %v1080_v34  ;;  %v1179_v26 = vsel %vm506_vm2, %v1176_v59, %v1178_v23  ;;  %1981 = vmatpush.bf16.msrb.mxu0 %v4648_v51  ;;  %1798 = vmatpush.bf16.msra.mxu2 %v4644_v62  ;;  %v4661_v2 = vld [vmem:[#allocation6 + $0x370] sm:$0xff]  ;;  %v4633_v18 = vld [vmem:[#allocation6 + $0x2a0] sm:$0xff]  ;;  %v4656_v51 = vld [vmem:[#allocation6 + $0x348] sm:$0xff] }
 0x149   : > { %v1093_v29 = vor.u32 %v1092_v9, %v1089_v24  ;;  %v4659_v23 = vld [vmem:[#allocation6 + $0x360] sm:$0xff]  ;;  %v5799_v9 = vld [vmem:[#allocation9 + $0x1] ss:$0 sm:$0xff] }
 0x14a   : > { %v1085_v8 = vsel %vm392_vm0, %v1075_v46, %v1084_v6  ;;  %1884 = vmatpush.bf16.msra.mxu3 %v4635_v0  ;;  %v4655_v60 = vld [vmem:[#allocation6 + $0x340] sm:$0xff] }
 0x14b   : > { %1159 = vmatmul.bf16.gmra.mxu1 %v1085_v8  ;;  %v1094_v30 = vsel %vm392_vm0, %v1084_v6, %v1093_v29  ;;  %v4643_v6 = vld [vmem:[#allocation6 + $0x2f0] sm:$0xff]  ;;  %v4637_v0 = vld [vmem:[#allocation6 + $0x2c0] sm:$0xff] }
 0x14c   : > { %1982 = vmatpush.bf16.msrb.mxu0 %v4647_v53  ;;  %2128 = vmatpush.bf16.msra.mxu1 %v4661_v2 }
 0x14d   : > { %1799 = vmatpush.bf16.msra.mxu2 %v4643_v6 }
 0x14e   : > { %1885 = vmatpush.bf16.msra.mxu3 %v4634_v7 }
 0x150   : > { %1983 = vmatpush.bf16.msrb.mxu0 %v4646_v55  ;;  %2129 = vmatpush.bf16.msra.mxu1 %v4660_v13 }
 0x151   : > { %1800 = vmatpush.bf16.msra.mxu2 %v4642_v17 }
 0x152   : > { %1886 = vmatpush.bf16.msra.mxu3 %v4633_v18 }
 0x154   : > { %1984 = vmatpush.bf16.msrb.mxu0 %v4645_v58  ;;  %2130 = vmatpush.bf16.msra.mxu1 %v4659_v23 }
 0x156   : > { %1493 = vmatmul.bf16.gmra.mxu0 %v1423_v25  ;;  %v4641_v25 = vld [vmem:[#allocation6 + $0x2e0] sm:$0xff] }
 0x157   : > { %1249 = vmatmul.bf16.gmra.mxu2 %v1179_v26  ;;  %v4632_v26 = vld [vmem:[#allocation6 + $0x298] sm:$0xff] }
 0x158   : > { %1801 = vmatpush.bf16.msra.mxu2 %v4641_v25  ;;  %1887 = vmatpush.bf16.msra.mxu3 %v4632_v26 }
 0x159   : > { %2131 = vmatpush.bf16.msra.mxu1 %v4658_v35 }
 0x15b   : > { %1164 = vmatmul.bf16.gmra.mxu1 %v1094_v30 }
 0x15c   : > { %1888 = vmatpush.bf16.msra.mxu3 %v4631_v42 }
 0x16b   : > { %1591 = vmatmul.bf16.vlgmr.msrb.gmra.mxu1 %v1527_v38 }
 0x17b   : > { %1596 = vmatmul.bf16.gmra.mxu1 %v1529_v41  ;;  %v4640_v41 = vld [vmem:[#allocation6 + $0x2d8] sm:$0xff] }
 0x17c   : > { %1802 = vmatpush.bf16.msra.mxu2 %v4640_v41  ;;  %v4937_v41 = vld [vmem:[#allocation2 + $0x4] sm:$0x8] }
 0x180   : > { %1803 = vmatpush.bf16.msra.mxu2 %v4639_v20 }
 0x18b   : > { %1601 = vmatmul.bf16.gmra.mxu1 %v1531_v44 }
 0x19a   : > { %v1334_v56 = vpop.f32.mrf.mxu3 }
 0x1a2   : > { %v1336_v43 = vpop.f32.mrf.mxu3 }
 0x1aa   : > { %v1339_v29 = vpop.f32.mrf.mxu3 }
 0x1b3   : > { %v1484_v57 = vpop.f32.mrf.mxu0 }
 0x1b4   : > { %v1155_v46 = vpop.f32.mrf.mxu1 }
 0x1b6   : > { %v1240_v52 = vpop.f32.mrf.mxu2 }
 0x1b7   : > { %v1241_v4 = vadd.f32 %v1240_v52, %v1155_v46  ;;  %v1341_v52 = vpop.f32.mrf.mxu3 }
 0x1b9   : > { %v1349_v34 = vadd.f32 %v1334_v56, %v1241_v4  ;;  %v4638_v56 = vld [vmem:[#allocation6 + $0x2c8] sm:$0xff] }
 0x1ba   : > { %1804 = vmatpush.bf16.msra.mxu2 %v4638_v56 }
 0x1bb   : > { %v1486_v5 = vpop.f32.mrf.mxu0  ;;  %v1499_v12 = vadd.f32 %v1484_v57, %v1349_v34  ;;  %v4629_v57 = vld [vmem:[#allocation6 + $0x280] sm:$0xff] }
 0x1bc   : > { %v1157_v21 = vpop.f32.mrf.mxu1 }
 0x1be   : > { %v1242_v59 = vpop.f32.mrf.mxu2  ;;  %1805 = vmatpush.bf16.msra.mxu2 %v4637_v0 }
 0x1bf   : > { %v1243_v11 = vadd.f32 %v1242_v59, %v1157_v21  ;;  %v4657_v21 = vld [vmem:[#allocation6 + $0x350] sm:$0xff] }
 0x1c0   : > { %2132 = vmatpush.bf16.msra.mxu1 %v4657_v21  ;;  %v4668_v21 = vld [vmem:[#allocation6 + $0x3a8] sm:$0xff] }
 0x1c1   : > { %v1350_v47 = vadd.f32 %v1336_v43, %v1243_v11 }
 0x1c3   : > { %v1489_v30 = vpop.f32.mrf.mxu0  ;;  %v1500_v22 = vadd.f32 %v1486_v5, %v1350_v47  ;;  %v1344_v7 = vpop.f32.mrf.mxu3 }
 0x1c4   : > { %2133 = vmatpush.bf16.msra.mxu1 %v4656_v51 }
 0x1c8   : > { %v1160_v19 = vpop.f32.mrf.mxu1  ;;  %2134 = vmatpush.bf16.msra.mxu1 %v4655_v60 }
 0x1ca   : > { %v1245_v8 = vpop.f32.mrf.mxu2 }
 0x1cb   : > { %v1246_v33 = vadd.f32 %v1245_v8, %v1160_v19  ;;  %v4630_v19 = vld [vmem:[#allocation6 + $0x288] sm:$0xff]  ;;  %v1491_v27 = vpop.f32.mrf.mxu0 }
 0x1cc   : > { %1889 = vmatpush.bf16.msra.mxu3 %v4630_v19 }
 0x1cd   : > { %v1351_v44 = vadd.f32 %v1339_v29, %v1246_v33 }
 0x1cf   : > { %v1501_v45 = vadd.f32 %v1489_v30, %v1351_v44  ;;  %v1346_v30 = vpop.f32.mrf.mxu3 }
 0x1d0   : > { %v5790_v50 = vpop.f32.mrf.mxu1  ;;  %1890 = vmatpush.bf16.msra.mxu3 %v4629_v57  ;;  %v4666_v57 = vld [vmem:[#allocation6 + $0x398] sm:$0xff] }
 0x1d2   : > { %v1247_v36 = vpop.f32.mrf.mxu2 }
 0x1d3   : > { %v1248_v31 = vadd.f32 %v1247_v36, %v5790_v50  ;;  %v1494_v18 = vpop.f32.mrf.mxu0 }
 0x1d5   : > { %v1352_v4 = vadd.f32 %v1341_v52, %v1248_v31  ;;  %v4667_v52 = vld [vmem:[#allocation6 + $0x3a0] sm:$0xff] }
 0x1d7   : > { %v1502_v6 = vadd.f32 %v1491_v27, %v1352_v4 }
 0x1d8   : > { %v5792_v54 = vpop.f32.mrf.mxu1 }
 0x1da   : > { %v1250_v58 = vpop.f32.mrf.mxu2 }
 0x1db   : > { %v1251_v43 = vadd.f32 %v1250_v58, %v5792_v54  ;;  %v4669_v54 = vld [vmem:[#allocation6 + $0x3b0] sm:$0xff] }
 0x1e0   : > { %v5794_v61 = vpop.f32.mrf.mxu1 }
 0x1e2   : > { %v1252_v47 = vpop.f32.mrf.mxu2 }
 0x1e8   : > { %v1592_v14 = vpop.f32.mrf.mxu1 }
 0x1e9   : > { %v1607_v15 = vadd.f32 %v1592_v14, %v1499_v12  ;;  %v4670_v14 = vld [vmem:[#allocation6 + $0x3b8] sm:$0xff] }
 0x1ea   : > { %2235 = vmatpush.bf16.msrb.mxu2 %v4670_v14 }
 0x1eb   : > { %v1615_v24 = vmul.f32 %v5796_v16, %v1607_v15  ;;  %v1353_v15 = vadd.f32 %v1344_v7, %v1251_v43 }
 0x1ed   : > { %v1623_v38 = vadd.f32 %v5799_v9, %v1615_v24  ;;  %v1253_v24 = vadd.f32 %v1252_v47, %v5794_v61  ;;  %v1503_v25 = vadd.f32 %v1494_v18, %v1353_v15  ;;  %v4665_v47 = vld [vmem:[#allocation6 + $0x390] sm:$0xff] }
 0x1ee   : > { %2236 = vmatpush.bf16.msrb.mxu2 %v4669_v54 }
 0x1ef   : > { %5133 = vtanh.f32 %v1623_v38 }
 0x1f0   : > { %v1594_v37 = vpop.f32.mrf.mxu1 }
 0x1f1   : > { %v1608_v39 = vadd.f32 %v1594_v37, %v1500_v22  ;;  %v1354_v22 = vadd.f32 %v1346_v30, %v1253_v24  ;;  %v1496_v37 = vpop.f32.mrf.mxu0  ;;  %v4663_v24 = vld [vmem:[#allocation6 + $0x380] sm:$0xff] }
 0x1f2   : > { %2237 = vmatpush.bf16.msrb.mxu2 %v4668_v21 }
 0x1f3   : > { %v1616_v46 = vmul.f32 %v5796_v16, %v1608_v39  ;;  %v1504_v44 = vadd.f32 %v1496_v37, %v1354_v22 }
 0x1f5   : > { %v1624_v48 = vadd.f32 %v5799_v9, %v1616_v46  ;;  %v5134_v59 = vpop.eup %5133 }
 0x1f6   : > { %v1635_v34 = vsel %vm5688_vm8, %v5134_v59, 0.0  ;;  %2238 = vmatpush.bf16.msrb.mxu2 %v4667_v52 }
 0x1f7   : > { %5135 = vtanh.f32 %v1624_v48 }
 0x1f8   : > { %v1597_v53 = vpop.f32.mrf.mxu1 }
 0x1f9   : > { %v1609_v55 = vadd.f32 %v1597_v53, %v1501_v45 }
 0x1fa   : > { %2239 = vmatpush.bf16.msrb.mxu2 %v4666_v57 }
 0x1fb   : > { %v1617_v50 = vmul.f32 %v5796_v16, %v1609_v55 }
 0x1fd   : > { %v5136_v62 = vpop.eup %5135  ;;  %v1625_v11 = vadd.f32 %v5799_v9, %v1617_v50 }
 0x1fe   : > { %v1636_v2 = vsel %vm5692_vm9, %v5136_v62, 0.0  ;;  %v5176_v13 = vpack.c.bf16 %v5136_v62, %v5134_v59  ;;  %2240 = vmatpush.bf16.msrb.mxu2 %v4665_v47  ;;  %v4693_v47 = vld [vmem:[#allocation6 + $0x470] sm:$0xff] }
 0x1ff   : > { %v5811_v5 = vpack.c.bf16 %v1636_v2, %v1635_v34  ;;  %5137 = vtanh.f32 %v1625_v11 }
 0x200   : > { %v1599_v8 = vpop.f32.mrf.mxu1  ;;  %5177 = vmatmul.msk.bf16.vlgmr.msrb.gmra.mxu0 %vm5712_vm10, %v5176_v13 }
 0x201   : > { %4890 = vst [vmem:[#allocation2 + $0x8] sm:$0xff] %v5811_v5   ;;  %v1610_v12 = vadd.f32 %v1599_v8, %v1502_v6  ;;  %v2051_v51 = vshll.u32 %v5811_v5, 16  ;;  %v2049_v60 = vshrl.u32 %v5811_v5, 16 }
 0x203   : > { %v1618_v17 = vmul.f32 %v5796_v16, %v1610_v12  ;;  %v2053_v27 = vrot.slane %v2051_v51, 1 }
 0x205   : > { %v1626_v23 = vadd.f32 %v5799_v9, %v1618_v17  ;;  %v5138_v33 = vpop.eup %5137  ;;  %v2054_v43 = vor.u32 %v2053_v27, %v2049_v60 }
 0x206   : > { %v1637_v38 = vsel %vm5723_vm15, %v5138_v33, 0.0 }
 0x207   : > { %5139 = vtanh.f32 %v1626_v23  ;;  %v4664_v23 = vld [vmem:[#allocation6 + $0x388] sm:$0xff] }
 0x208   : > { %v1602_v26 = vpop.f32.mrf.mxu1  ;;  %v4985_v61 = vld [vmem:[#allocation2 + $0x4] sm:$0xf0]   ;;  %2241 = vmatpush.bf16.msrb.mxu2 %v4664_v23 }
 0x209   : > { %v1611_v29 = vadd.f32 %v1602_v26, %v1503_v25  ;;  %v4938_v31 = vor.u32 %v4985_v61, %v4937_v41 }
 0x20b   : > { %v1619_v36 = vmul.f32 %v5796_v16, %v1611_v29  ;;  %v1713_v55 = vshrl.u32 %v4938_v31, 16  ;;  %v1716_v56 = vshll.u32 %v4938_v31, 16  ;;  %v1825_v4 = vrot.slane %v4938_v31, 3 }
 0x20c   : > { %2242 = vmatpush.bf16.msrb.mxu2 %v4663_v24  ;;  %v4691_v24 = vld [vmem:[#allocation6 + $0x460] sm:$0xff] }
 0x20d   : > { %v5140_v35 = vpop.eup %5139  ;;  %v1627_v48 = vadd.f32 %v5799_v9, %v1619_v36  ;;  %v1715_v62 = vrot.slane %v1713_v55, 3 }
 0x20e   : > { %v1638_v39 = vsel %vm5727_vm4, %v5140_v35, 0.0  ;;  %v5179_v19 = vpack.c.bf16 %v5140_v35, %v5138_v33 }
 0x20f   : > { %v5825_v42 = vpack.c.bf16 %v1638_v39, %v1637_v38  ;;  %5141 = vtanh.f32 %v1627_v48 }
 0x210   : > { %v1604_v46 = vpop.f32.mrf.mxu1  ;;  %5180 = vmatmul.msk.bf16.gmra.mxu0 %vm5747_vm5, %v5179_v19 }
 0x211   : > { %4891 = vst [vmem:[#allocation2 + $0x10] sm:$0xff] %v5825_v42   ;;  %v1612_v20 = vadd.f32 %v1604_v46, %v1504_v44  ;;  %v4816_v29 = vunpack.c.h.b16 %v5825_v42  ;;  %v2013_v44 = vld [vmem:[#allocation2 + $0x20] sm:$0x1] }
 0x212   : > { %v2043_v19 = vunpack.c.l.b16 %v2013_v44 }
 0x213   : > { %v1620_v45 = vmul.f32 %v5796_v16, %v1612_v20  ;;  %v1718_v16 = vrot.slane %v1716_v56, 4 }
 0x215   : > { %v1628_v53 = vadd.f32 %v5799_v9, %v1620_v45  ;;  %v5142_v9 = vpop.eup %5141  ;;  %v1719_v13 = vor.u32 %v1718_v16, %v1715_v62 }
 0x216   : > { %v1639_v5 = vsel %vm5761_vm13, %v5142_v9, 0.0 }
 0x217   : > { %5143 = vtanh.f32 %v1628_v53  ;;  %v2047_v53 = vpack.c.b16 %v2043_v19, %v2043_v19  ;;  %v4685_v19 = vld [vmem:[#allocation6 + $0x430] sm:$0xff] }
 0x218   : > { %v4986_v58 = vld [vmem:[#allocation2 + $0xc] sm:$0xff]  }
 0x219   : > { %v5834_v59 = vld [vmem:[#allocation2 + $0x10] sm:$0xff]  ;;  %v1826_v50 = vrot.slane %v4986_v58, 3  ;;  %v1721_v34 = vshrl.u32 %v4986_v58, 16  ;;  %v1724_v2 = vshll.u32 %v4986_v58, 16  ;;  %v2072_v55 = vshll.u32 %v2047_v53, 16 }
 0x21a   : > { %v2056_v0 = vshll.u32 %v5834_v59, 16  ;;  %v2060_v22 = vshrl.u32 %v5834_v59, 16 }
 0x21b   : > { %v1827_v6 = vsel %vm506_vm2, %v1825_v4, %v1826_v50  ;;  %v1723_v8 = vrot.slane %v1721_v34, 3  ;;  %v1726_v11 = vrot.slane %v1724_v2, 4  ;;  %v2074_v60 = vrot.slane %v2072_v55, 1 }
 0x21c   : > { %v2058_v7 = vrot.slane %v2056_v0, 1  ;;  %1891 = vmatmul.bf16.vlgmr.msra.gmra.mxu3 %v1827_v6  ;;  %v4897_v6 = vld [vmem:[#allocation2 + $0x8] sm:$0xe] }
 0x21d   : > { %v5144_v12 = vpop.eup %5143  ;;  %v1727_v17 = vor.u32 %v1726_v11, %v1723_v8  ;;  %v2178_v8 = vrot.slane %v5834_v59, 1  ;;  %v4692_v59 = vld [vmem:[#allocation6 + $0x468] sm:$0xff] }
 0x21e   : > { %v1640_v14 = vsel %vm5767_vm14, %v5144_v12, 0.0  ;;  %v2059_v15 = vsel %vm730_vm1, %v2054_v43, %v2058_v7  ;;  %v2062_v37 = vor.u32 %v2060_v22, %v2058_v7  ;;  %v4896_v43 = vld [vmem:[#allocation2 + $0x8] sm:$0xf0]  ;;  %v4688_v22 = vld [vmem:[#allocation6 + $0x448] sm:$0xff] }
 0x21f   : > { %v4807_v54 = vpack.c.bf16 %v1640_v14, %v1639_v5  ;;  %2135 = vmatmul.bf16.vlgmr.msra.gmra.mxu1 %v2059_v15  ;;  %v1728_v18 = vsel %vm392_vm0, %v1719_v13, %v1727_v17  ;;  %v4898_v7 = vor.u32 %v4897_v6, %v4896_v43  ;;  %v2182_v14 = vrot.slane %v2047_v53, 1  ;;  %v4702_v53 = vld [vmem:[#allocation6 + $0x4a8] sm:$0xff]  ;;  %v4700_v6 = vld [vmem:[#allocation6 + $0x498] sm:$0xff] }
 0x220   : > { %1806 = vmatmul.bf16.vlgmr.msra.gmra.mxu2 %v1728_v18  ;;  %v4694_v18 = vld [vmem:[#allocation6 + $0x478] sm:$0xff] }
 0x221   : > { %4892 = vst [vmem:[#allocation2 + $0x18] sm:$0xff] %v4807_v54   ;;  %v2177_v11 = vrot.slane %v4898_v7, 1  ;;  %2629 = vmatpush.bf16.msrb.mxu1 %v4694_v18 }
 0x223   : > { %v2179_v12 = vsel %vm860_vm3, %v2177_v11, %v2178_v8 }
 0x225   : > { %2630 = vmatpush.bf16.msrb.mxu1 %v4693_v47  ;;  %v4681_v47 = vld [vmem:[#allocation6 + $0x410] sm:$0xff] }
 0x228   : > { %v1658_v25 = vld [vmem:[#allocation2 + $0x18] sm:$0xff]  }
 0x229   : > { %v4654_v26 = vld [vmem:[#allocation2 + $0x18] sm:$0xff]  ;;  %v1706_v30 = vunpack.c.l.b16 %v1658_v25  ;;  %v1707_v33 = vunpack.c.h.b16 %v1658_v25  ;;  %1995 = vmatmul.bf16.gmra.mxu0 %v1658_v25  ;;  %2631 = vmatpush.bf16.msrb.mxu1 %v4692_v59 }
 0x22a   : > { %v2064_v35 = vshll.u32 %v4654_v26, 16  ;;  %v1659_v20 = vld [vmem:[#allocation2 + $0x1c] sm:$0x7]  ;;  %v2068_v58 = vshrl.u32 %v4654_v26, 16  ;;  %v2180_v13 = vrot.slane %v4654_v26, 1  ;;  %v4690_v26 = vld [vmem:[#allocation6 + $0x458] sm:$0xff] }
 0x22b   : > { %v1710_v36 = vpack.c.b16 %v1706_v30, %v4816_v29  ;;  %v1711_v45 = vpack.c.b16 %v1707_v33, %v1707_v33  ;;  %v1823_v52 = vunpack.c.l.b16 %v1659_v20  ;;  %v4689_v29 = vld [vmem:[#allocation6 + $0x450] sm:$0xff] }
 0x22c   : > { %v2066_v38 = vrot.slane %v2064_v35, 1  ;;  %v2181_v5 = vsel %vm860_vm3, %v2178_v8, %v2180_v13  ;;  %v2183_v15 = vsel %vm860_vm3, %v2180_v13, %v2182_v14  ;;  %v4682_v13 = vld [vmem:[#allocation6 + $0x418] sm:$0xff] }
 0x22d   : > { %v1828_v39 = vrot.slane %v1710_v36, 3  ;;  %v1730_v41 = vshrl.u32 %v1710_v36, 16  ;;  %v1733_v61 = vshll.u32 %v1710_v36, 16  ;;  %v1824_v56 = vpack.c.b16 %v1823_v52, %v1823_v52  ;;  %2632 = vmatpush.bf16.msrb.mxu1 %v4691_v24 }
 0x22e   : > { %v2067_v46 = vsel %vm730_vm1, %v2062_v37, %v2066_v38  ;;  %v1739_v57 = vshrl.u32 %v1711_v45, 16  ;;  %v1742_v27 = vshll.u32 %v1711_v45, 16  ;;  %v2070_v4 = vor.u32 %v2068_v58, %v2066_v38  ;;  %v4678_v37 = vld [vmem:[#allocation6 + $0x3f8] sm:$0xff]  ;;  %v4687_v38 = vld [vmem:[#allocation6 + $0x440] sm:$0xff]  ;;  %v4684_v58 = vld [vmem:[#allocation6 + $0x428] sm:$0xff] }
 0x22f   : > { %v1829_v21 = vsel %vm506_vm2, %v1826_v50, %v1828_v39  ;;  %2140 = vmatmul.bf16.gmra.mxu1 %v2067_v46  ;;  %v1732_v42 = vrot.slane %v1730_v41, 3  ;;  %v1735_v48 = vrot.slane %v1733_v61, 4  ;;  %v1830_v62 = vrot.slane %v1824_v56, 3  ;;  %2535 = vmatpush.bf16.msra.mxu0 %v4678_v37  ;;  %v4704_v41 = vld [vmem:[#allocation6 + $0x4b8] sm:$0xff] }
 0x230   : > { %1896 = vmatmul.bf16.gmra.mxu3 %v1829_v21  ;;  %v1741_v16 = vrot.slane %v1739_v57, 3  ;;  %v1744_v50 = vrot.slane %v1742_v27, 4  ;;  %v2075_v0 = vsel %vm730_vm1, %v2070_v4, %v2074_v60  ;;  %v4686_v46 = vld [vmem:[#allocation6 + $0x438] sm:$0xff]  ;;  %2779 = vmatpush.bf16.msra.mxu2 %v4704_v41  ;;  %v4677_v21 = vld [vmem:[#allocation6 + $0x3f0] sm:$0xff]  ;;  %v5863_v27 = vld [vmem:[#allocation8 + $0x2] ss:$0 sm:$0xff] }
 0x231   : > { %v1736_v31 = vor.u32 %v1735_v48, %v1732_v42  ;;  %v1831_v34 = vsel %vm506_vm2, %v1828_v39, %v1830_v62  ;;  %2633 = vmatpush.bf16.msrb.mxu1 %v4690_v26  ;;  %2450 = vmatpush.bf16.msrb.mxu3 %v4686_v46  ;;  %v4703_v48 = vld [vmem:[#allocation6 + $0x4b0] sm:$0xff]  ;;  %v4675_v4 = vld [vmem:[#allocation6 + $0x3e0] sm:$0xff]  ;;  %v4698_v26 = vld [vmem:[#allocation6 + $0x488] sm:$0xff] }
 0x232   : > { %v1745_v2 = vor.u32 %v1744_v50, %v1741_v16  ;;  %v4701_v62 = vld [vmem:[#allocation6 + $0x4a0] sm:$0xff]  ;;  %v5866_v50 = vld [vmem:[#allocation9 + $0x2] ss:$0 sm:$0xff] }
 0x233   : > { %v1737_v51 = vsel %vm392_vm0, %v1727_v17, %v1736_v31  ;;  %2536 = vmatpush.bf16.msra.mxu0 %v4677_v21  ;;  %v4697_v41 = vld [vmem:[#allocation6 + $0x480] sm:$0xff] }
 0x234   : > { %1811 = vmatmul.bf16.gmra.mxu2 %v1737_v51  ;;  %v1746_v9 = vsel %vm392_vm0, %v1736_v31, %v1745_v2  ;;  %v4676_v31 = vld [vmem:[#allocation6 + $0x3e8] sm:$0xff]  ;;  %v4679_v21 = vld [vmem:[#allocation6 + $0x400] sm:$0xff] }
 0x235   : > { %2634 = vmatpush.bf16.msrb.mxu1 %v4689_v29  ;;  %2780 = vmatpush.bf16.msra.mxu2 %v4703_v48 }
 0x236   : > { %2451 = vmatpush.bf16.msrb.mxu3 %v4685_v19 }
 0x237   : > { %2537 = vmatpush.bf16.msra.mxu0 %v4676_v31 }
 0x239   : > { %2635 = vmatpush.bf16.msrb.mxu1 %v4688_v22  ;;  %2781 = vmatpush.bf16.msra.mxu2 %v4702_v53 }
 0x23a   : > { %2452 = vmatpush.bf16.msrb.mxu3 %v4684_v58 }
 0x23b   : > { %2538 = vmatpush.bf16.msra.mxu0 %v4675_v4 }
 0x23d   : > { %2636 = vmatpush.bf16.msrb.mxu1 %v4687_v38  ;;  %2782 = vmatpush.bf16.msra.mxu2 %v4701_v62 }
 0x23f   : > { %2145 = vmatmul.bf16.gmra.mxu1 %v2075_v0  ;;  %v4683_v0 = vld [vmem:[#allocation6 + $0x420] sm:$0xff] }
 0x240   : > { %1901 = vmatmul.bf16.gmra.mxu3 %v1831_v34  ;;  %v4674_v34 = vld [vmem:[#allocation6 + $0x3d8] sm:$0xff] }
 0x241   : > { %2453 = vmatpush.bf16.msrb.mxu3 %v4683_v0  ;;  %2539 = vmatpush.bf16.msra.mxu0 %v4674_v34 }
 0x242   : > { %2783 = vmatpush.bf16.msra.mxu2 %v4700_v6 }
 0x244   : > { %1816 = vmatmul.bf16.gmra.mxu2 %v1746_v9 }
 0x245   : > { %2454 = vmatpush.bf16.msrb.mxu3 %v4682_v13  ;;  %v4946_v13 = vld [vmem:[#allocation2 + $0x4] sm:$0x8] }
 0x249   : > { %2455 = vmatpush.bf16.msrb.mxu3 %v4681_v47 }
 0x254   : > { %2243 = vmatmul.bf16.vlgmr.msrb.gmra.mxu2 %v2179_v12 }
 0x264   : > { %2248 = vmatmul.bf16.gmra.mxu2 %v2181_v5  ;;  %v4673_v5 = vld [vmem:[#allocation6 + $0x3d0] sm:$0xff] }
 0x265   : > { %2540 = vmatpush.bf16.msra.mxu0 %v4673_v5 }
 0x274   : > { %2253 = vmatmul.bf16.gmra.mxu2 %v2183_v15 }
 0x27d   : > { %v1986_v35 = vpop.f32.mrf.mxu0 }
 0x285   : > { %v1988_v20 = vpop.f32.mrf.mxu0 }
 0x28d   : > { %v1991_v2 = vpop.f32.mrf.mxu0 }
 0x295   : > { %v1993_v29 = vpop.f32.mrf.mxu0 }
 0x29c   : > { %v2136_v36 = vpop.f32.mrf.mxu1 }
 0x29f   : > { %v1892_v30 = vpop.f32.mrf.mxu3 }
 0x2a3   : > { %v1807_v17 = vpop.f32.mrf.mxu2 }
 0x2a4   : > { %v1893_v39 = vadd.f32 %v1892_v30, %v1807_v17  ;;  %v2138_v45 = vpop.f32.mrf.mxu1 }
 0x2a6   : > { %v2001_v42 = vadd.f32 %v1986_v35, %v1893_v39  ;;  %v4680_v35 = vld [vmem:[#allocation6 + $0x408] sm:$0xff] }
 0x2a7   : > { %v1894_v61 = vpop.f32.mrf.mxu3  ;;  %2456 = vmatpush.bf16.msrb.mxu3 %v4680_v35  ;;  %v4709_v35 = vld [vmem:[#allocation6 + $0x4e0] sm:$0xff] }
 0x2a8   : > { %v2151_v52 = vadd.f32 %v2136_v36, %v2001_v42  ;;  %v4671_v36 = vld [vmem:[#allocation6 + $0x3c0] sm:$0xff] }
 0x2ab   : > { %v1809_v54 = vpop.f32.mrf.mxu2  ;;  %2457 = vmatpush.bf16.msrb.mxu3 %v4679_v21 }
 0x2ac   : > { %v1895_v51 = vadd.f32 %v1894_v61, %v1809_v54  ;;  %v2141_v7 = vpop.f32.mrf.mxu1  ;;  %v4699_v54 = vld [vmem:[#allocation6 + $0x490] sm:$0xff] }
 0x2ad   : > { %2784 = vmatpush.bf16.msra.mxu2 %v4699_v54 }
 0x2ae   : > { %v2002_v60 = vadd.f32 %v1988_v20, %v1895_v51 }
 0x2b0   : > { %v2152_v43 = vadd.f32 %v2138_v45, %v2002_v60  ;;  %v1996_v45 = vpop.f32.mrf.mxu0 }
 0x2b1   : > { %2785 = vmatpush.bf16.msra.mxu2 %v4698_v26 }
 0x2b3   : > { %v1897_v55 = vpop.f32.mrf.mxu3 }
 0x2b4   : > { %v2143_v37 = vpop.f32.mrf.mxu1 }
 0x2b5   : > { %2786 = vmatpush.bf16.msra.mxu2 %v4697_v41 }
 0x2b7   : > { %v1812_v23 = vpop.f32.mrf.mxu2 }
 0x2b8   : > { %v1898_v9 = vadd.f32 %v1897_v55, %v1812_v23  ;;  %v4672_v23 = vld [vmem:[#allocation6 + $0x3c8] sm:$0xff]  ;;  %v1998_v34 = vpop.f32.mrf.mxu0 }
 0x2b9   : > { %2541 = vmatpush.bf16.msra.mxu0 %v4672_v23 }
 0x2ba   : > { %v2003_v15 = vadd.f32 %v1991_v2, %v1898_v9 }
 0x2bb   : > { %v1899_v14 = vpop.f32.mrf.mxu3 }
 0x2bc   : > { %v2153_v24 = vadd.f32 %v2141_v7, %v2003_v15  ;;  %v2146_v58 = vpop.f32.mrf.mxu1 }
 0x2bd   : > { %2542 = vmatpush.bf16.msra.mxu0 %v4671_v36 }
 0x2bf   : > { %v5857_v25 = vpop.f32.mrf.mxu2 }
 0x2c0   : > { %v1900_v59 = vadd.f32 %v1899_v14, %v5857_v25 }
 0x2c2   : > { %v2004_v39 = vadd.f32 %v1993_v29, %v1900_v59  ;;  %v4710_v59 = vld [vmem:[#allocation6 + $0x4e8] sm:$0xff] }
 0x2c3   : > { %v1902_v61 = vpop.f32.mrf.mxu3 }
 0x2c4   : > { %v2154_v31 = vadd.f32 %v2143_v37, %v2004_v39 }
 0x2c7   : > { %v5859_v33 = vpop.f32.mrf.mxu2 }
 0x2c8   : > { %v1903_v20 = vadd.f32 %v1902_v61, %v5859_v33 }
 0x2cb   : > { %v1904_v4 = vpop.f32.mrf.mxu3 }
 0x2cf   : > { %v5861_v44 = vpop.f32.mrf.mxu2 }
 0x2d0   : > { %v1905_v60 = vadd.f32 %v1904_v4, %v5861_v44 }
 0x2d2   : > { %v2006_v9 = vadd.f32 %v1998_v34, %v1905_v60  ;;  %v4707_v60 = vld [vmem:[#allocation6 + $0x4d0] sm:$0xff] }
 0x2d7   : > { %v2244_v56 = vpop.f32.mrf.mxu2 }
 0x2d8   : > { %v2259_v57 = vadd.f32 %v2244_v56, %v2151_v52  ;;  %v2005_v56 = vadd.f32 %v1996_v45, %v1903_v20 }
 0x2da   : > { %v2267_v16 = vmul.f32 %v5863_v27, %v2259_v57  ;;  %v2155_v62 = vadd.f32 %v2146_v58, %v2005_v56 }
 0x2dc   : > { %v2275_v11 = vadd.f32 %v5866_v50, %v2267_v16 }
 0x2de   : > { %5145 = vtanh.f32 %v2275_v11  ;;  %v2148_v11 = vpop.f32.mrf.mxu1 }
 0x2df   : > { %v2246_v8 = vpop.f32.mrf.mxu2  ;;  %v2156_v15 = vadd.f32 %v2148_v11, %v2006_v9 }
 0x2e0   : > { %v2260_v12 = vadd.f32 %v2246_v8, %v2152_v43  ;;  %v4712_v43 = vld [vmem:[#allocation6 + $0x4f8] sm:$0xff]  ;;  %v4711_v8 = vld [vmem:[#allocation6 + $0x4f0] sm:$0xff] }
 0x2e1   : > { %2887 = vmatpush.bf16.msra.mxu3 %v4712_v43 }
 0x2e2   : > { %v2268_v17 = vmul.f32 %v5863_v27, %v2260_v12 }
 0x2e4   : > { %v2276_v18 = vadd.f32 %v5866_v50, %v2268_v17  ;;  %v5146_v38 = vpop.eup %5145 }
 0x2e5   : > { %v2287_v42 = vsel %vm5688_vm8, %v5146_v38, 0.0  ;;  %2888 = vmatpush.bf16.msra.mxu3 %v4711_v8 }
 0x2e6   : > { %5147 = vtanh.f32 %v2276_v18 }
 0x2e7   : > { %v2249_v30 = vpop.f32.mrf.mxu2 }
 0x2e8   : > { %v2261_v22 = vadd.f32 %v2249_v30, %v2153_v24 }
 0x2e9   : > { %2889 = vmatpush.bf16.msra.mxu3 %v4710_v59 }
 0x2ea   : > { %v2269_v25 = vmul.f32 %v5863_v27, %v2261_v22 }
 0x2ec   : > { %v5148_v46 = vpop.eup %5147  ;;  %v2277_v52 = vadd.f32 %v5866_v50, %v2269_v25 }
 0x2ed   : > { %v2288_v48 = vsel %vm5692_vm9, %v5148_v46, 0.0  ;;  %v5182_v55 = vpack.c.bf16 %v5148_v46, %v5146_v38  ;;  %2890 = vmatpush.bf16.msra.mxu3 %v4709_v35 }
 0x2ee   : > { %v5878_v19 = vpack.c.bf16 %v2288_v48, %v2287_v42  ;;  %5149 = vtanh.f32 %v2277_v52 }
 0x2ef   : > { %v2251_v51 = vpop.f32.mrf.mxu2  ;;  %5183 = vmatmul.msk.bf16.vlgmr.msrb.gmra.mxu1 %vm5712_vm10, %v5182_v55 }
 0x2f0   : > { %4899 = vst [vmem:[#allocation2 + $0x8] sm:$0xff] %v5878_v19   ;;  %v2262_v53 = vadd.f32 %v2251_v51, %v2154_v31  ;;  %v2703_v26 = vshll.u32 %v5878_v19, 16  ;;  %v2701_v41 = vshrl.u32 %v5878_v19, 16 }
 0x2f2   : > { %v2270_v57 = vmul.f32 %v5863_v27, %v2262_v53  ;;  %v2705_v36 = vrot.slane %v2703_v26, 1 }
 0x2f4   : > { %v2278_v33 = vadd.f32 %v5866_v50, %v2270_v57  ;;  %v5150_v2 = vpop.eup %5149  ;;  %v2706_v20 = vor.u32 %v2705_v36, %v2701_v41 }
 0x2f5   : > { %v2289_v12 = vsel %vm5723_vm15, %v5150_v2, 0.0 }
 0x2f6   : > { %5151 = vtanh.f32 %v2278_v33 }
 0x2f7   : > { %v2254_v16 = vpop.f32.mrf.mxu2  ;;  %v4988_v5 = vld [vmem:[#allocation2 + $0x4] sm:$0xf0]  }
 0x2f8   : > { %v2263_v0 = vadd.f32 %v2254_v16, %v2155_v62  ;;  %v4947_v23 = vor.u32 %v4988_v5, %v4946_v13  ;;  %v4706_v62 = vld [vmem:[#allocation6 + $0x4c8] sm:$0xff]  ;;  %v4705_v16 = vld [vmem:[#allocation6 + $0x4c0] sm:$0xff] }
 0x2fa   : > { %v2271_v7 = vmul.f32 %v5863_v27, %v2263_v0  ;;  %v2365_v30 = vshrl.u32 %v4947_v23, 16  ;;  %v2368_v22 = vshll.u32 %v4947_v23, 16  ;;  %v2477_v39 = vrot.slane %v4947_v23, 3 }
 0x2fc   : > { %v5152_v6 = vpop.eup %5151  ;;  %v2279_v54 = vadd.f32 %v5866_v50, %v2271_v7  ;;  %v2367_v61 = vrot.slane %v2365_v30, 3  ;;  %v2370_v46 = vrot.slane %v2368_v22, 4 }
 0x2fd   : > { %v2290_v44 = vsel %vm5727_vm4, %v5152_v6, 0.0  ;;  %v5185_v47 = vpack.c.bf16 %v5152_v6, %v5150_v2 }
 0x2fe   : > { %v5892_v14 = vpack.c.bf16 %v2290_v44, %v2289_v12  ;;  %5153 = vtanh.f32 %v2279_v54  ;;  %v2371_v55 = vor.u32 %v2370_v46, %v2367_v61 }
 0x2ff   : > { %v2256_v17 = vpop.f32.mrf.mxu2  ;;  %5186 = vmatmul.msk.bf16.gmra.mxu1 %vm5747_vm5, %v5185_v47 }
 0x300   : > { %4900 = vst [vmem:[#allocation2 + $0x10] sm:$0xff] %v5892_v14   ;;  %v2264_v18 = vadd.f32 %v2256_v17, %v2156_v15  ;;  %v4843_v2 = vunpack.c.h.b16 %v5892_v14  ;;  %v2665_v15 = vld [vmem:[#allocation2 + $0x20] sm:$0x1] }
 0x301   : > { %v2695_v23 = vunpack.c.l.b16 %v2665_v15 }
 0x302   : > { %v2272_v24 = vmul.f32 %v5863_v27, %v2264_v18  ;;  %v4708_v27 = vld [vmem:[#allocation6 + $0x4d8] sm:$0xff] }
 0x303   : > { %2891 = vmatpush.bf16.msra.mxu3 %v4708_v27  ;;  %v2699_v30 = vpack.c.b16 %v2695_v23, %v2695_v23  ;;  %v4727_v23 = vld [vmem:[#allocation6 + $0x570] sm:$0xff] }
 0x304   : > { %v2280_v29 = vadd.f32 %v5866_v50, %v2272_v24  ;;  %v5154_v48 = vpop.eup %5153 }
 0x305   : > { %v2291_v19 = vsel %vm5761_vm13, %v5154_v48, 0.0  ;;  %v2724_v22 = vshll.u32 %v2699_v30, 16 }
 0x306   : > { %5155 = vtanh.f32 %v2280_v29 }
 0x307   : > { %v4989_v37 = vld [vmem:[#allocation2 + $0xc] sm:$0xff]   ;;  %2892 = vmatpush.bf16.msra.mxu3 %v4707_v60  ;;  %v2726_v61 = vrot.slane %v2724_v22, 1 }
 0x308   : > { %v5901_v38 = vld [vmem:[#allocation2 + $0x10] sm:$0xff]  ;;  %v2478_v25 = vrot.slane %v4989_v37, 3  ;;  %v2373_v50 = vshrl.u32 %v4989_v37, 16  ;;  %v2376_v42 = vshll.u32 %v4989_v37, 16  ;;  %v4735_v60 = vld [vmem:[#allocation6 + $0x5b0] sm:$0xff] }
 0x309   : > { %v2708_v21 = vshll.u32 %v5901_v38, 16  ;;  %v2712_v6 = vshrl.u32 %v5901_v38, 16 }
 0x30a   : > { %v2479_v31 = vsel %vm506_vm2, %v2477_v39, %v2478_v25  ;;  %v2375_v51 = vrot.slane %v2373_v50, 3  ;;  %v2378_v52 = vrot.slane %v2376_v42, 4 }
 0x30b   : > { %v2710_v45 = vrot.slane %v2708_v21, 1  ;;  %2543 = vmatmul.bf16.vlgmr.msra.gmra.mxu0 %v2479_v31  ;;  %2893 = vmatpush.bf16.msra.mxu3 %v4706_v62  ;;  %v4906_v31 = vld [vmem:[#allocation2 + $0x8] sm:$0xe] }
 0x30c   : > { %v5156_v53 = vpop.eup %5155  ;;  %v2379_v58 = vor.u32 %v2378_v52, %v2375_v51  ;;  %v2830_v51 = vrot.slane %v5901_v38, 1  ;;  %v4734_v38 = vld [vmem:[#allocation6 + $0x5a8] sm:$0xff] }
 0x30d   : > { %v2292_v56 = vsel %vm5767_vm14, %v5156_v53, 0.0  ;;  %v2711_v57 = vsel %vm730_vm1, %v2706_v20, %v2710_v45  ;;  %v2714_v11 = vor.u32 %v2712_v6, %v2710_v45  ;;  %v4905_v20 = vld [vmem:[#allocation2 + $0x8] sm:$0xf0]  ;;  %v4730_v6 = vld [vmem:[#allocation6 + $0x588] sm:$0xff] }
 0x30e   : > { %v4834_v33 = vpack.c.bf16 %v2292_v56, %v2291_v19  ;;  %2787 = vmatmul.bf16.vlgmr.msra.gmra.mxu2 %v2711_v57  ;;  %v2380_v4 = vsel %vm392_vm0, %v2371_v55, %v2379_v58  ;;  %v4907_v45 = vor.u32 %v4906_v31, %v4905_v20  ;;  %v2834_v56 = vrot.slane %v2699_v30, 1  ;;  %v4744_v30 = vld [vmem:[#allocation6 + $0x5e8] sm:$0xff]  ;;  %v4742_v31 = vld [vmem:[#allocation6 + $0x5d8] sm:$0xff] }
 0x30f   : > { %2458 = vmatmul.bf16.vlgmr.msrb.gmra.mxu3 %v2380_v4  ;;  %v4736_v4 = vld [vmem:[#allocation6 + $0x5b8] sm:$0xff] }
 0x310   : > { %4901 = vst [vmem:[#allocation2 + $0x18] sm:$0xff] %v4834_v33   ;;  %2894 = vmatpush.bf16.msra.mxu3 %v4705_v16  ;;  %v2829_v52 = vrot.slane %v4907_v45, 1  ;;  %3273 = vmatpush.bf16.msrb.mxu2 %v4736_v4  ;;  %v4733_v16 = vld [vmem:[#allocation6 + $0x5a0] sm:$0xff] }
 0x312   : > { %v2831_v53 = vsel %vm860_vm3, %v2829_v52, %v2830_v51 }
 0x314   : > { %3274 = vmatpush.bf16.msrb.mxu2 %v4735_v60  ;;  %v4723_v60 = vld [vmem:[#allocation6 + $0x550] sm:$0xff] }
 0x317   : > { %v2310_v0 = vld [vmem:[#allocation2 + $0x18] sm:$0xff]  }
 0x318   : > { %v4696_v34 = vld [vmem:[#allocation2 + $0x18] sm:$0xff]  ;;  %v2358_v9 = vunpack.c.l.b16 %v2310_v0  ;;  %v2359_v43 = vunpack.c.h.b16 %v2310_v0  ;;  %2647 = vmatmul.bf16.gmra.mxu1 %v2310_v0  ;;  %3275 = vmatpush.bf16.msrb.mxu2 %v4734_v38 }
 0x319   : > { %v2716_v7 = vshll.u32 %v4696_v34, 16  ;;  %v2311_v47 = vld [vmem:[#allocation2 + $0x1c] sm:$0x7]  ;;  %v2720_v39 = vshrl.u32 %v4696_v34, 16  ;;  %v2832_v55 = vrot.slane %v4696_v34, 1  ;;  %v4732_v34 = vld [vmem:[#allocation6 + $0x598] sm:$0xff] }
 0x31a   : > { %v2362_v8 = vpack.c.b16 %v2358_v9, %v4843_v2  ;;  %v2363_v24 = vpack.c.b16 %v2359_v43, %v2359_v43  ;;  %v2475_v29 = vunpack.c.l.b16 %v2311_v47  ;;  %v4731_v2 = vld [vmem:[#allocation6 + $0x590] sm:$0xff] }
 0x31b   : > { %v2718_v12 = vrot.slane %v2716_v7, 1  ;;  %v2833_v19 = vsel %vm860_vm3, %v2830_v51, %v2832_v55  ;;  %v2835_v57 = vsel %vm860_vm3, %v2832_v55, %v2834_v56  ;;  %v4724_v55 = vld [vmem:[#allocation6 + $0x558] sm:$0xff] }
 0x31c   : > { %v2480_v44 = vrot.slane %v2362_v8, 3  ;;  %v2382_v13 = vshrl.u32 %v2362_v8, 16  ;;  %v2385_v5 = vshll.u32 %v2362_v8, 16  ;;  %v2476_v35 = vpack.c.b16 %v2475_v29, %v2475_v29  ;;  %3276 = vmatpush.bf16.msrb.mxu2 %v4733_v16 }
 0x31d   : > { %v2719_v17 = vsel %vm730_vm1, %v2714_v11, %v2718_v12  ;;  %v2391_v36 = vshrl.u32 %v2363_v24, 16  ;;  %v2394_v37 = vshll.u32 %v2363_v24, 16  ;;  %v2722_v41 = vor.u32 %v2720_v39, %v2718_v12  ;;  %v4720_v11 = vld [vmem:[#allocation6 + $0x538] sm:$0xff]  ;;  %v4729_v12 = vld [vmem:[#allocation6 + $0x580] sm:$0xff]  ;;  %v4726_v39 = vld [vmem:[#allocation6 + $0x568] sm:$0xff] }
 0x31e   : > { %v2481_v54 = vsel %vm506_vm2, %v2478_v25, %v2480_v44  ;;  %2792 = vmatmul.bf16.gmra.mxu2 %v2719_v17  ;;  %v2384_v14 = vrot.slane %v2382_v13, 3  ;;  %v2387_v18 = vrot.slane %v2385_v5, 4  ;;  %v2482_v46 = vrot.slane %v2476_v35, 3  ;;  %3183 = vmatpush.bf16.msra.mxu1 %v4720_v11  ;;  %v4746_v13 = vld [vmem:[#allocation6 + $0x5f8] sm:$0xff] }
 0x31f   : > { %2548 = vmatmul.bf16.gmra.mxu0 %v2481_v54  ;;  %v2393_v27 = vrot.slane %v2391_v36, 3  ;;  %v2396_v25 = vrot.slane %v2394_v37, 4  ;;  %v2727_v21 = vsel %vm730_vm1, %v2722_v41, %v2726_v61  ;;  %v4728_v17 = vld [vmem:[#allocation6 + $0x578] sm:$0xff]  ;;  %3415 = vmatpush.bf16.msrb.mxu3 %v4746_v13  ;;  %v4719_v54 = vld [vmem:[#allocation6 + $0x530] sm:$0xff]  ;;  %v5930_v37 = vld [vmem:[#allocation8 + $0x3] ss:$0 sm:$0xff] }
 0x320   : > { %v2388_v59 = vor.u32 %v2387_v18, %v2384_v14  ;;  %v2483_v50 = vsel %vm506_vm2, %v2480_v44, %v2482_v46  ;;  %3277 = vmatpush.bf16.msrb.mxu2 %v4732_v34  ;;  %3102 = vmatpush.bf16.msrb.mxu0 %v4728_v17  ;;  %v4745_v18 = vld [vmem:[#allocation6 + $0x5f0] sm:$0xff]  ;;  %v4717_v41 = vld [vmem:[#allocation6 + $0x520] sm:$0xff]  ;;  %v4740_v34 = vld [vmem:[#allocation6 + $0x5c8] sm:$0xff] }
 0x321   : > { %v2397_v42 = vor.u32 %v2396_v25, %v2393_v27  ;;  %v4743_v46 = vld [vmem:[#allocation6 + $0x5e0] sm:$0xff]  ;;  %v5933_v25 = vld [vmem:[#allocation9 + $0x3] ss:$0 sm:$0xff] }
 0x322   : > { %v2389_v26 = vsel %vm392_vm0, %v2379_v58, %v2388_v59  ;;  %3184 = vmatpush.bf16.msra.mxu1 %v4719_v54  ;;  %v4739_v13 = vld [vmem:[#allocation6 + $0x5c0] sm:$0xff] }
 0x323   : > { %2463 = vmatmul.bf16.gmra.mxu3 %v2389_v26  ;;  %v2398_v48 = vsel %vm392_vm0, %v2388_v59, %v2397_v42  ;;  %v4718_v59 = vld [vmem:[#allocation6 + $0x528] sm:$0xff]  ;;  %v4721_v54 = vld [vmem:[#allocation6 + $0x540] sm:$0xff] }
 0x324   : > { %3278 = vmatpush.bf16.msrb.mxu2 %v4731_v2  ;;  %3416 = vmatpush.bf16.msrb.mxu3 %v4745_v18 }
 0x325   : > { %3103 = vmatpush.bf16.msrb.mxu0 %v4727_v23 }
 0x326   : > { %3185 = vmatpush.bf16.msra.mxu1 %v4718_v59 }
 0x328   : > { %3279 = vmatpush.bf16.msrb.mxu2 %v4730_v6  ;;  %3417 = vmatpush.bf16.msrb.mxu3 %v4744_v30 }
 0x329   : > { %3104 = vmatpush.bf16.msrb.mxu0 %v4726_v39 }
 0x32a   : > { %3186 = vmatpush.bf16.msra.mxu1 %v4717_v41  ;;  %v4752_v41 = vld [vmem:[#allocation6 + $0x628] sm:$0xff] }
 0x32c   : > { %3280 = vmatpush.bf16.msrb.mxu2 %v4729_v12  ;;  %3418 = vmatpush.bf16.msrb.mxu3 %v4743_v46 }
 0x32e   : > { %2797 = vmatmul.bf16.gmra.mxu2 %v2727_v21  ;;  %v4725_v21 = vld [vmem:[#allocation6 + $0x560] sm:$0xff] }
 0x32f   : > { %2553 = vmatmul.bf16.gmra.mxu0 %v2483_v50  ;;  %v4716_v50 = vld [vmem:[#allocation6 + $0x518] sm:$0xff] }
 0x330   : > { %3105 = vmatpush.bf16.msrb.mxu0 %v4725_v21  ;;  %3187 = vmatpush.bf16.msra.mxu1 %v4716_v50  ;;  %v4751_v50 = vld [vmem:[#allocation6 + $0x620] sm:$0xff] }
 0x331   : > { %3419 = vmatpush.bf16.msrb.mxu3 %v4742_v31 }
 0x333   : > { %2468 = vmatmul.bf16.gmra.mxu3 %v2398_v48 }
 0x334   : > { %3106 = vmatpush.bf16.msrb.mxu0 %v4724_v55  ;;  %v4955_v55 = vld [vmem:[#allocation2 + $0x4] sm:$0x8] }
 0x338   : > { %3107 = vmatpush.bf16.msrb.mxu0 %v4723_v60 }
 0x343   : > { %2895 = vmatmul.bf16.vlgmr.msra.gmra.mxu3 %v2831_v53 }
 0x353   : > { %2900 = vmatmul.bf16.gmra.mxu3 %v2833_v19  ;;  %v4715_v19 = vld [vmem:[#allocation6 + $0x510] sm:$0xff] }
 0x354   : > { %3188 = vmatpush.bf16.msra.mxu1 %v4715_v19 }
 0x363   : > { %2905 = vmatmul.bf16.gmra.mxu3 %v2835_v57 }
 0x36c   : > { %v2638_v7 = vpop.f32.mrf.mxu1 }
 0x374   : > { %v2640_v47 = vpop.f32.mrf.mxu1 }
 0x37c   : > { %v2643_v42 = vpop.f32.mrf.mxu1 }
 0x384   : > { %v2645_v2 = vpop.f32.mrf.mxu1 }
 0x388   : > { %v2544_v9 = vpop.f32.mrf.mxu0 }
 0x390   : > { %v2546_v5 = vpop.f32.mrf.mxu0 }
 0x391   : > { %v2788_v8 = vpop.f32.mrf.mxu2 }
 0x392   : > { %v2459_v58 = vpop.f32.mrf.mxu3 }
 0x393   : > { %v2545_v44 = vadd.f32 %v2544_v9, %v2459_v58 }
 0x395   : > { %v2653_v14 = vadd.f32 %v2638_v7, %v2545_v44  ;;  %v4722_v7 = vld [vmem:[#allocation6 + $0x548] sm:$0xff] }
 0x396   : > { %3108 = vmatpush.bf16.msrb.mxu0 %v4722_v7  ;;  %v4747_v7 = vld [vmem:[#allocation6 + $0x600] sm:$0xff] }
 0x397   : > { %v2803_v29 = vadd.f32 %v2788_v8, %v2653_v14  ;;  %v4713_v8 = vld [vmem:[#allocation6 + $0x500] sm:$0xff]  ;;  %v4754_v14 = vld [vmem:[#allocation6 + $0x638] sm:$0xff] }
 0x398   : > { %4970 = vmatpush.bf16.msra.mxu2 %v4754_v14 }
 0x399   : > { %v2790_v24 = vpop.f32.mrf.mxu2 }
 0x39a   : > { %v2461_v33 = vpop.f32.mrf.mxu3  ;;  %3109 = vmatpush.bf16.msrb.mxu0 %v4721_v54 }
 0x39b   : > { %v2547_v26 = vadd.f32 %v2546_v5, %v2461_v33  ;;  %v4741_v33 = vld [vmem:[#allocation6 + $0x5d0] sm:$0xff] }
 0x39c   : > { %v2549_v22 = vpop.f32.mrf.mxu0  ;;  %3420 = vmatpush.bf16.msrb.mxu3 %v4741_v33  ;;  %4971 = vmatpush.bf16.msra.mxu2 %v4753_v10  ;;  %v4749_v33 = vld [vmem:[#allocation6 + $0x610] sm:$0xff] }
 0x39d   : > { %v2654_v61 = vadd.f32 %v2640_v47, %v2547_v26  ;;  %v2648_v26 = vpop.f32.mrf.mxu1 }
 0x39e   : > { %3515 = vmatpush.bf16.msra.mxu0 %v4754_v14 }
 0x39f   : > { %v2804_v20 = vadd.f32 %v2790_v24, %v2654_v61 }
 0x3a0   : > { %3421 = vmatpush.bf16.msrb.mxu3 %v4740_v34  ;;  %4972 = vmatpush.bf16.msra.mxu2 %v4752_v41 }
 0x3a1   : > { %v2793_v45 = vpop.f32.mrf.mxu2 }
 0x3a2   : > { %3516 = vmatpush.bf16.msra.mxu0 %v4753_v10 }
 0x3a4   : > { %v2551_v56 = vpop.f32.mrf.mxu0  ;;  %3422 = vmatpush.bf16.msrb.mxu3 %v4739_v13  ;;  %4973 = vmatpush.bf16.msra.mxu2 %v4751_v50 }
 0x3a6   : > { %v2464_v62 = vpop.f32.mrf.mxu3  ;;  %3517 = vmatpush.bf16.msra.mxu0 %v4752_v41 }
 0x3a7   : > { %v2550_v48 = vadd.f32 %v2549_v22, %v2464_v62  ;;  %v4714_v62 = vld [vmem:[#allocation6 + $0x508] sm:$0xff] }
 0x3a8   : > { %3189 = vmatpush.bf16.msra.mxu1 %v4714_v62 }
 0x3a9   : > { %v2655_v57 = vadd.f32 %v2643_v42, %v2550_v48  ;;  %v2795_v11 = vpop.f32.mrf.mxu2  ;;  %v2650_v42 = vpop.f32.mrf.mxu1 }
 0x3aa   : > { %3518 = vmatpush.bf16.msra.mxu0 %v4751_v50 }
 0x3ab   : > { %v2805_v16 = vadd.f32 %v2793_v45, %v2655_v57 }
 0x3ac   : > { %3190 = vmatpush.bf16.msra.mxu1 %v4713_v8  ;;  %v2554_v5 = vpop.f32.mrf.mxu0 }
 0x3ae   : > { %v5924_v0 = vpop.f32.mrf.mxu3 }
 0x3af   : > { %v2552_v38 = vadd.f32 %v2551_v56, %v5924_v0 }
 0x3b1   : > { %v2656_v44 = vadd.f32 %v2645_v2, %v2552_v38 }
 0x3b3   : > { %v2806_v24 = vadd.f32 %v2795_v11, %v2656_v44 }
 0x3b4   : > { %v2556_v61 = vpop.f32.mrf.mxu0 }
 0x3b6   : > { %v5926_v43 = vpop.f32.mrf.mxu3 }
 0x3b7   : > { %v2555_v23 = vadd.f32 %v2554_v5, %v5926_v43 }
 0x3be   : > { %v5928_v15 = vpop.f32.mrf.mxu3 }
 0x3bf   : > { %v2557_v46 = vadd.f32 %v2556_v61, %v5928_v15 }
 0x3c6   : > { %v2896_v35 = vpop.f32.mrf.mxu3 }
 0x3c7   : > { %v2911_v36 = vadd.f32 %v2896_v35, %v2803_v29  ;;  %v2657_v35 = vadd.f32 %v2648_v26, %v2555_v23 }
 0x3c9   : > { %v2919_v27 = vmul.f32 %v5930_v37, %v2911_v36  ;;  %v2798_v36 = vpop.f32.mrf.mxu2 }
 0x3cb   : > { %v2927_v52 = vadd.f32 %v5933_v25, %v2919_v27  ;;  %v2807_v27 = vadd.f32 %v2798_v36, %v2657_v35 }
 0x3cd   : > { %5157 = vtanh.f32 %v2927_v52 }
 0x3ce   : > { %v2898_v51 = vpop.f32.mrf.mxu3 }
 0x3cf   : > { %v2912_v53 = vadd.f32 %v2898_v51, %v2804_v20  ;;  %v2658_v20 = vadd.f32 %v2650_v42, %v2557_v46  ;;  %v4750_v51 = vld [vmem:[#allocation6 + $0x618] sm:$0xff]  ;;  %v3301_v42 = vld [vmem:[#allocation2 + $0x20] sm:$0x1] }
 0x3d0   : > { %4974 = vmatpush.bf16.msra.mxu2 %v4750_v51  ;;  %3519 = vmatpush.bf16.msra.mxu0 %v4750_v51  ;;  %v3331_v51 = vunpack.c.l.b16 %v3301_v42 }
 0x3d1   : > { %v2920_v58 = vmul.f32 %v5930_v37, %v2912_v53  ;;  %v2800_v52 = vpop.f32.mrf.mxu2 }
 0x3d2   : > { %v2808_v57 = vadd.f32 %v2800_v52, %v2658_v20 }
 0x3d3   : > { %v2928_v4 = vadd.f32 %v5933_v25, %v2920_v58  ;;  %v5158_v12 = vpop.eup %5157 }
 0x3d4   : > { %v2939_v18 = vsel %vm5688_vm8, %v5158_v12, 0.0  ;;  %4975 = vmatpush.bf16.msra.mxu2 %v4749_v33  ;;  %3520 = vmatpush.bf16.msra.mxu0 %v4749_v33 }
 0x3d5   : > { %5159 = vtanh.f32 %v2928_v4 }
 0x3d6   : > { %v2901_v9 = vpop.f32.mrf.mxu3 }
 0x3d7   : > { %v2913_v6 = vadd.f32 %v2901_v9, %v2805_v16  ;;  %v4748_v16 = vld [vmem:[#allocation6 + $0x608] sm:$0xff] }
 0x3d8   : > { %4976 = vmatpush.bf16.msra.mxu2 %v4748_v16  ;;  %3521 = vmatpush.bf16.msra.mxu0 %v4748_v16 }
 0x3d9   : > { %v2921_v0 = vmul.f32 %v5930_v37, %v2913_v6 }
 0x3db   : > { %v5160_v17 = vpop.eup %5159  ;;  %v2929_v30 = vadd.f32 %v5933_v25, %v2921_v0 }
 0x3dc   : > { %v2940_v47 = vsel %vm5692_vm9, %v5160_v17, 0.0  ;;  %v5188_v3 = vpack.c.bf16 %v5160_v17, %v5158_v12  ;;  %4977 = vmatpush.bf16.msra.mxu2 %v4747_v7  ;;  %3522 = vmatpush.bf16.msra.mxu0 %v4747_v7 }
 0x3dd   : > { %v5945_v59 = vpack.c.bf16 %v2940_v47, %v2939_v18  ;;  %5161 = vtanh.f32 %v2929_v30 }
 0x3de   : > { %v2903_v29 = vpop.f32.mrf.mxu3  ;;  %5189 = vmatmul.msk.bf16.vlgmr.msrb.gmra.mxu2 %vm5712_vm10, %v5188_v3 }
 0x3df   : > { %4908 = vst [vmem:[#allocation2 + $0x8] sm:$0xff] %v5945_v59   ;;  %v2914_v22 = vadd.f32 %v2903_v29, %v2806_v24  ;;  %v3339_v38 = vshll.u32 %v5945_v59, 16 }
 0x3e1   : > { %v2922_v43 = vmul.f32 %v5930_v37, %v2914_v22  ;;  %v3341_v6 = vrot.slane %v3339_v38, 1 }
 0x3e3   : > { %v2930_v39 = vadd.f32 %v5933_v25, %v2922_v43  ;;  %v5162_v48 = vpop.eup %5161 }
 0x3e4   : > { %v2941_v15 = vsel %vm5723_vm15, %v5162_v48, 0.0 }
 0x3e5   : > { %5163 = vtanh.f32 %v2930_v39 }
 0x3e6   : > { %v2906_v21 = vpop.f32.mrf.mxu3  ;;  %v4991_v19 = vld [vmem:[#allocation2 + $0x4] sm:$0xf0]  }
 0x3e7   : > { %v2915_v28 = vadd.f32 %v2906_v21, %v2807_v27  ;;  %v4956_v63 = vor.u32 %v4991_v19, %v4955_v55 }
 0x3e9   : > { %v2923_v45 = vmul.f32 %v5930_v37, %v2915_v28  ;;  %v3017_v2 = vshrl.u32 %v4956_v63, 16  ;;  %v3020_v9 = vshll.u32 %v4956_v63, 16  ;;  %v3125_v11 = vrot.slane %v4956_v63, 3 }
 0x3eb   : > { %v5164_v31 = vpop.eup %5163  ;;  %v2931_v4 = vadd.f32 %v5933_v25, %v2923_v45  ;;  %v3019_v12 = vrot.slane %v3017_v2, 3  ;;  %v3022_v44 = vrot.slane %v3020_v9, 4 }
 0x3ec   : > { %v2942_v53 = vsel %vm5727_vm4, %v5164_v31, 0.0  ;;  %v5191_v62 = vpack.c.bf16 %v5164_v31, %v5162_v48 }
 0x3ed   : > { %v5959_v56 = vpack.c.bf16 %v2942_v53, %v2941_v15  ;;  %5165 = vtanh.f32 %v2931_v4  ;;  %v3023_v26 = vor.u32 %v3022_v44, %v3019_v12  ;;  %v4915_v12 = vld [vmem:[#allocation2 + $0x8] sm:$0xe] }
 0x3ee   : > { %v2908_v58 = vpop.f32.mrf.mxu3  ;;  %5192 = vmatmul.msk.bf16.gmra.mxu2 %vm5747_vm5, %v5191_v62 }
 0x3ef   : > { %4909 = vst [vmem:[#allocation2 + $0x10] sm:$0xff] %v5959_v56   ;;  %v2916_v60 = vadd.f32 %v2908_v58, %v2808_v57  ;;  %v4870_v36 = vunpack.c.h.b16 %v5959_v56  ;;  %v3335_v56 = vpack.c.b16 %v3331_v51, %v3331_v51 }
 0x3f1   : > { %v2924_v49 = vmul.f32 %v5930_v37, %v2916_v60  ;;  %v3337_v37 = vshrl.u32 %v5945_v59, 16  ;;  %v3360_v57 = vshll.u32 %v3335_v56, 16  ;;  %v3462_v62 = vrot.slane %v3335_v56, 1 }
 0x3f3   : > { %v2932_v34 = vadd.f32 %v5933_v25, %v2924_v49  ;;  %v5166_v0 = vpop.eup %5165  ;;  %v3342_v54 = vor.u32 %v3341_v6, %v3337_v37  ;;  %v3362_v38 = vrot.slane %v3360_v57, 1  ;;  %v4914_v37 = vld [vmem:[#allocation2 + $0x8] sm:$0xf0] }
 0x3f4   : > { %v2943_v59 = vsel %vm5761_vm13, %v5166_v0, 0.0  ;;  %v4916_v44 = vor.u32 %v4915_v12, %v4914_v37 }
 0x3f5   : > { %5167 = vtanh.f32 %v2932_v34 }
 0x3f6   : > { %v4992_v8 = vld [vmem:[#allocation2 + $0xc] sm:$0xff]  }
 0x3f7   : > { %v5968_v1 = vld [vmem:[#allocation2 + $0x10] sm:$0xff]  ;;  %v3126_v13 = vrot.slane %v4992_v8, 3  ;;  %v3025_v17 = vshrl.u32 %v4992_v8, 16  ;;  %v3028_v25 = vshll.u32 %v4992_v8, 16 }
 0x3f8   : > { %v3344_v5 = vshll.u32 %v5968_v1, 16  ;;  %v3348_v40 = vshrl.u32 %v5968_v1, 16 }
 0x3f9   : > { %v3127_v14 = vsel %vm506_vm2, %v3125_v11, %v3126_v13  ;;  %v3027_v47 = vrot.slane %v3025_v17, 3  ;;  %v3030_v23 = vrot.slane %v3028_v25, 4 }
 0x3fa   : > { %v3346_v18 = vrot.slane %v3344_v5, 1  ;;  %3191 = vmatmul.bf16.vlgmr.msra.gmra.mxu1 %v3127_v14  ;;  %v3457_v5 = vrot.slane %v4916_v44, 1 }
 0x3fb   : > { %v5168_v24 = vpop.eup %5167  ;;  %v3031_v22 = vor.u32 %v3030_v23, %v3027_v47 }
 0x3fc   : > { %v2944_v29 = vsel %vm5767_vm14, %v5168_v24, 0.0  ;;  %v3347_v30 = vsel %vm730_vm1, %v3342_v54, %v3346_v18  ;;  %v3350_v46 = vor.u32 %v3348_v40, %v3346_v18 }
 0x3fd   : > { %v4861_v3 = vpack.c.bf16 %v2944_v29, %v2943_v59  ;;  %3423 = vmatmul.bf16.vlgmr.msrb.gmra.mxu3 %v3347_v30  ;;  %v3032_v10 = vsel %vm392_vm0, %v3023_v26, %v3031_v22 }
 0x3fe   : > { %3110 = vmatmul.bf16.vlgmr.msrb.gmra.mxu0 %v3032_v10 }
 0x3ff   : > { %4910 = vst [vmem:[#allocation2 + $0x18] sm:$0xff] %v4861_v3  }
 0x406   : > { %v2962_v35 = vld [vmem:[#allocation2 + $0x18] sm:$0xff]  }
 0x407   : > { %v4738_v43 = vld [vmem:[#allocation2 + $0x18] sm:$0xff]  ;;  %v3010_v39 = vunpack.c.l.b16 %v2962_v35  ;;  %v3011_v41 = vunpack.c.h.b16 %v2962_v35  ;;  %3289 = vmatmul.bf16.gmra.mxu2 %v2962_v35 }
 0x408   : > { %v3352_v61 = vshll.u32 %v4738_v43, 16  ;;  %v2963_v52 = vld [vmem:[#allocation2 + $0x1c] sm:$0x7]  ;;  %v3460_v60 = vrot.slane %v4738_v43, 1  ;;  %v3356_v63 = vshrl.u32 %v4738_v43, 16 }
 0x409   : > { %v3014_v32 = vpack.c.b16 %v3010_v39, %v4870_v36  ;;  %v3015_v53 = vpack.c.b16 %v3011_v41, %v3011_v41  ;;  %v3123_v19 = vunpack.c.l.b16 %v2963_v52 }
 0x40a   : > { %v3354_v27 = vrot.slane %v3352_v61, 1  ;;  %v3463_v9 = vsel %vm860_vm3, %v3460_v60, %v3462_v62 }
 0x40b   : > { %v3128_v21 = vrot.slane %v3014_v32, 3  ;;  %v3034_v28 = vshrl.u32 %v3014_v32, 16  ;;  %v3037_v50 = vshll.u32 %v3014_v32, 16  ;;  %v3124_v58 = vpack.c.b16 %v3123_v19, %v3123_v19 }
 0x40c   : > { %v3355_v48 = vsel %vm730_vm1, %v3350_v46, %v3354_v27  ;;  %v3043_v33 = vshrl.u32 %v3015_v53, 16  ;;  %v3046_v4 = vshll.u32 %v3015_v53, 16  ;;  %v3358_v49 = vor.u32 %v3356_v63, %v3354_v27 }
 0x40d   : > { %v3129_v20 = vsel %vm506_vm2, %v3126_v13, %v3128_v21  ;;  %3426 = vmatmul.bf16.gmra.mxu3 %v3355_v48  ;;  %v3036_v31 = vrot.slane %v3034_v28, 3  ;;  %v3039_v45 = vrot.slane %v3037_v50, 4  ;;  %v3130_v16 = vrot.slane %v3124_v58, 3 }
 0x40e   : > { %3194 = vmatmul.bf16.gmra.mxu1 %v3129_v20  ;;  %v3045_v34 = vrot.slane %v3043_v33, 3  ;;  %v3048_v2 = vrot.slane %v3046_v4, 4  ;;  %v3363_v6 = vsel %vm730_vm1, %v3358_v49, %v3362_v38  ;;  %v3458_v13 = vrot.slane %v5968_v1, 1 }
 0x40f   : > { %v3040_v15 = vor.u32 %v3039_v45, %v3036_v31  ;;  %v3131_v7 = vsel %vm506_vm2, %v3128_v21, %v3130_v16  ;;  %v5119_v45 = vld [vmem:[#allocation8 + $0x4] ss:$0 sm:$0xff] }
 0x410   : > { %v3049_v8 = vor.u32 %v3048_v2, %v3045_v34  ;;  %v3459_v17 = vsel %vm860_vm3, %v3457_v5, %v3458_v13  ;;  %v3461_v25 = vsel %vm860_vm3, %v3458_v13, %v3460_v60 }
 0x411   : > { %v3041_v55 = vsel %vm392_vm0, %v3031_v22, %v3040_v15 }
 0x412   : > { %3113 = vmatmul.bf16.gmra.mxu0 %v3041_v55  ;;  %v3050_v11 = vsel %vm392_vm0, %v3040_v15, %v3049_v8  ;;  %v5120_v15 = vld [vmem:[#allocation9 + $0x4] ss:$0 sm:$0xff] }
 0x417   : > { %3531 = vmatmul.bf16.vlgmr.msra.gmra.mxu2 %v3463_v9 }
 0x41d   : > { %3431 = vmatmul.bf16.gmra.mxu3 %v3363_v6 }
 0x41e   : > { %3199 = vmatmul.bf16.gmra.mxu1 %v3131_v7 }
 0x422   : > { %3118 = vmatmul.bf16.gmra.mxu0 %v3050_v11 }
 0x432   : > { %3523 = vmatmul.bf16.vlgmr.msra.gmra.mxu0 %v3459_v17 }
 0x442   : > { %3526 = vmatmul.bf16.gmra.mxu0 %v3461_v25 }
 0x461   : > { %v3282_v0 = vpop.f32.mrf.mxu2 }
 0x469   : > { %v3283_v54 = vpop.f32.mrf.mxu2 }
 0x471   : > { %v3285_v18 = vpop.f32.mrf.mxu2 }
 0x477   : > { %v3192_v14 = vpop.f32.mrf.mxu1 }
 0x479   : > { %v3287_v59 = vpop.f32.mrf.mxu2 }
 0x47b   : > { %v3111_v47 = vpop.f32.mrf.mxu0 }
 0x47f   : > { %v3193_v23 = vpop.f32.mrf.mxu1 }
 0x480   : > { %v3424_v24 = vpop.f32.mrf.mxu3 }
 0x483   : > { %v3112_v26 = vpop.f32.mrf.mxu0 }
 0x488   : > { %v3425_v29 = vpop.f32.mrf.mxu3 }
 0x48a   : > { %v3290_v22 = vpop.f32.mrf.mxu2 }
 0x48b   : > { %v3195_v30 = vpop.f32.mrf.mxu1 }
 0x48f   : > { %v3114_v1 = vpop.f32.mrf.mxu0 }
 0x490   : > { %v3427_v3 = vpop.f32.mrf.mxu3  ;;  %v3196_v50 = vadd.f32 %v3195_v30, %v3114_v1 }
 0x492   : > { %v3291_v35 = vpop.f32.mrf.mxu2  ;;  %v3293_v48 = vadd.f32 %v3285_v18, %v3196_v50 }
 0x493   : > { %v3197_v10 = vpop.f32.mrf.mxu1 }
 0x494   : > { %v3435_v20 = vadd.f32 %v3427_v3, %v3293_v48 }
 0x497   : > { %v3116_v43 = vpop.f32.mrf.mxu0 }
 0x498   : > { %v3429_v36 = vpop.f32.mrf.mxu3  ;;  %v3198_v31 = vadd.f32 %v3197_v10, %v3116_v43 }
 0x49a   : > { %v3532_v41 = vpop.f32.mrf.mxu2  ;;  %v3294_v53 = vadd.f32 %v3287_v59, %v3198_v31 }
 0x49b   : > { %v3200_v39 = vpop.f32.mrf.mxu1 }
 0x49c   : > { %v3436_v56 = vadd.f32 %v3429_v36, %v3294_v53 }
 0x49f   : > { %v3119_v40 = vpop.f32.mrf.mxu0 }
 0x4a0   : > { %v3432_v61 = vpop.f32.mrf.mxu3 }
 0x4a2   : > { %v3533_v46 = vpop.f32.mrf.mxu2 }
 0x4a3   : > { %v3201_v32 = vpop.f32.mrf.mxu1 }
 0x4a7   : > { %v3120_v27 = vpop.f32.mrf.mxu0 }
 0x4a8   : > { %v3433_v21 = vpop.f32.mrf.mxu3 }
 0x4af   : > { %v3524_v28 = vpop.f32.mrf.mxu0 }
 0x4b7   : > { %v3525_v42 = vpop.f32.mrf.mxu0 }
 0x4bf   : > { %v3527_v51 = vpop.f32.mrf.mxu0 }
 0x4c0   : > { %v3535_v52 = vadd.f32 %v3527_v51, %v3435_v20 }
 0x4c2   : > { %v3539_v55 = vmul.f32 %v5119_v45, %v3535_v52 }
 0x4c4   : > { %v3543_v19 = vadd.f32 %v5120_v15, %v3539_v55 }
 0x4c6   : > { %3545 = vst [vmem:[%s281_s18] sm:$0xff] %v3543_v19 }
 0x4c7   : > { %v3529_v57 = vpop.f32.mrf.mxu0 }
 0x4c8   : > { %v3536_v58 = vadd.f32 %v3529_v57, %v3436_v56 }
 0x4ca   : > { %v3540_v33 = vmul.f32 %v5119_v45, %v3536_v58 }
 0x4cc   : > { %v3544_v4 = vadd.f32 %v5120_v15, %v3540_v33 }
 0x4ce   : > { %3546 = vst [vmem:[%s281_s18 + $0x8] sm:$0xff] %v3544_v4 }
 0x4cf   : > { %5340 = shalt.err (!%p5337_p13)
}
 0x4d0   : > { %s5434_s23 = smov 128   ;;  %s5435_s3 = smov 8  }
 0x4d1   : > { %5011 = dma.vmem_to_hbm [thread:$0]  (%p5568_p3), %s3563_s19, 256, %s3565_s24, %s3548_s30, %s5434_s23, %s5434_s23, %s5435_s3  }
 0x4d2 PF: > { %s6084_s1 = sld [smem:[#allocation16_spill]]  ;;  %p5038_p0 = scmp.ge.s32.totalorder %s5426_s22, 2 }
 0x4d4   : > { %p5028_p5 = pnand %p5038_p0, %p5520_p6 }
 0x4d6   : > { %p5029_p7 = pneg %p5028_p5 }
 0x4d8   : > { %s3579_s15 = sand.u32 1, %s6084_s1  }
 0x4d9   : > { %s3580_s20 = scalar_lea.sflag [#allocation5], %s3579_s15 }
 0x4da   : > { %5386 = dma.done.wait (%p5029_p7), %s3580_s20, 256  }
 0x4db   : > { %5388 = vsyncadd (%p5029_p7), %s3580_s20, 4294967040  ;;  %s22_s22 = sadd.s32 1, %s5426_s22   ;;  %s6086_s18 = sld [smem:[#allocation17_spill]] }
 0x4dc   : > { %p19_p9 = scmp.ge.s32.totalorder %s22_s22, 10   ;;  %s6087_s20 = sld [smem:[#allocation19_spill]] }
 0x4dd   : > { %s6088_s9 = sld [smem:[#allocation20_spill]]  ;;  %s6089_s15 = smov %s5402_s16 }
 0x4de   : > { %s6090_s16 = smov %s5406_s17  ;;  %s6091_s17 = smov %s5581_s13 }
 0x4df   : > { %s6092_s19 = smov %s5422_s21  ;;  %21 = sbr.rel (!%p19_p9) target bundleno = 13 (0xd), region = 97 }
 0x4e3   : > { %s6093_s21 = smov %s6088_s9 }
 0x4e4   :  { %3586 = vsyncpa [#allocation4], 1 }
 0x4e5   :  { %3588 = vsyncpa [#allocation4 + $0x1], 1 }
 0x4e6   :  { %3589 = vsyncpa [#allocation7], 1 }
 0x4e7   :  { %3590 = vsyncpa [#allocation10], 1 }
 0x4e8   :  { %3591 = vsyncpa [#allocation5], 1 }
 0x4e9   :  { %3593 = vsyncpa [#allocation5 + $0x1], 1 }

</bundles_post_ra>
